<compile_context>
chip_gen: v7x
topology: tpu7x:2x2x1
jax: 0.10.0
libtpu: 0.0.40
codegen_flags: <defaults>
</compile_context>

<pallas_src>
import functools

import jax
import jax.numpy as jnp
from jax import lax
from jax.experimental import pallas as pl
from jax.experimental.pallas import tpu as pltpu


# ---------------------------------------------------------------------------
# Single fused kernel
# ---------------------------------------------------------------------------
def _fused_kernel(xn_ref, aux_ref, wgat_ref, bd_ref,
                  w1, w2, w3, w4, w5, w6, w7t, ball_ref, out_ref,
                  *, N, S, H, F, Cin, O, LO):
    f32, bf16 = jnp.float32, jnp.bfloat16
    SH = S * H
    SHN, SHF = SH * N, SH * F

    # static row offsets inside the packed f32 aux operand
    r_xt, r_wl = 0, Cin
    r_adj, r_mt = 2 * Cin, 2 * Cin + N
    r_od, r_gb = 2 * Cin + 2 * N, 2 * Cin + 2 * N + 1

    # ---- GATConv projection + dst-side attention logits: ONE MXU pass ------
    #   zr[:, :SHF]        = z[src, (s, h, f)]     (per-seq/head projection)
    #   zr[:, SHF:SHF+SHN] = er[dst, (s, h, src)]  (attn_r folded through W)
    zr = jnp.dot(xn_ref[...], wgat_ref[...], preferred_element_type=f32)
    z_nodes = zr[:, :SHF]                                    # (N, SHF)
    er_mat = zr[:, SHF:SHF + SHN]                            # (N, SHN)

    # src-side logits el[(s,h,src)] : x^T * folded attn_l, sublane reduce
    x_t = aux_ref[r_xt:r_xt + Cin, :SHN]                     # (Cin, SHN)
    wl_pat = aux_ref[r_wl:r_wl + Cin, :SHN]                  # (Cin, SHN)
    el_row = jnp.sum(x_t * wl_pat, axis=0, keepdims=True)    # (1, SHN)

    # ---- lane-packed masked edge softmax over all (seq, head) blocks -------
    adj_big = aux_ref[r_adj:r_adj + N, :SHN]                 # edge counts, tiled SH times
    e = er_mat + el_row                                      # e[dst, (s,h,src)]
    e = jnp.where(e > 0.0, e, 0.2 * e)                       # LeakyReLU(0.2)
    m = jnp.max(e, axis=1, keepdims=True)                    # per-dst shift (softmax-invariant)
    w = adj_big * jnp.exp(e - m)                             # 0 where no edge; counts duplicates

    # block-diagonal RHS [ z_bd | bd ] : one matmul yields both the
    # un-normalized aggregation and the per-(dst, seq, head) softmax denominator
    bdf = bd_ref[...].astype(f32)                            # (SHN, SHF) 0/1 block-diag mask
    z_tile = jnp.concatenate([z_nodes] * SH, axis=0)         # (SHN, SHF)
    rhs = jnp.concatenate([z_tile * bdf, bdf], axis=1)       # (SHN, 2*SHF)
    agg = jnp.dot(w, rhs, preferred_element_type=f32)        # (N, 2*SHF)
    denom = jnp.maximum(agg[:, SHF:], 1e-30)                 # underflow guard
    gat_bias = aux_ref[r_gb:r_gb + 1, :SHF]                  # (1, SHF)
    gat_flat = agg[:, :SHF] / denom + gat_bias               # == gatEmb.view(-1, F*H*S)

    # ---- 7-layer MLP (bf16 weights, f32 accum); Linear(32,1) merged with
    #      linear_trans into one (SHF+32, 1) weight -----------------------------
    hid = gat_flat
    for wr_ref, i, width in ((w1, 0, 180), (w2, 1, 150), (w3, 2, 128),
                             (w4, 3, 80), (w5, 4, 64), (w6, 5, 32)):
        hid = jnp.dot(hid.astype(bf16), wr_ref[...], preferred_element_type=f32)
        hid = jnp.maximum(hid + ball_ref[i:i + 1, 0:width], 0.0)
    cat = jnp.concatenate([gat_flat, hid], axis=1)           # (N, SHF+32), 128-aligned concat
    ge = (jnp.dot(cat.astype(bf16), w7t[...], preferred_element_type=f32)
          + ball_ref[6:7, 0:1])                              # (N, 1) = gatEmb_nor + wx

    # ---- od2PathNumModel: od->path edge softmax + demand aggregation -------
    mt = aux_ref[r_mt:r_mt + N, :]                           # (N, LA) membership (path, od)
    od_row = aux_ref[r_od:r_od + 1, :]                       # (1, LA)
    member = mt > 0.0
    gmax = jnp.max(ge, axis=0, keepdims=True)                # column-invariant shift
    w2_ = jnp.where(member, jnp.exp(ge - gmax), 0.0)         # (N, LA)
    den2 = jnp.maximum(jnp.sum(w2_, axis=0, keepdims=True), 1e-30)
    probT = w2_ / den2                                       # prob[od, path] transposed
    flow = jnp.sum(probT * od_row, axis=1, keepdims=True)    # (N, 1) predFlow

    # ---- single lane-dense store: [ probT | predFlow | 0 ] -----------------
    lane = lax.broadcasted_iota(jnp.int32, (N, LO), 1)
    out_ref[...] = jnp.where(lane == O, flow, probT[:, :LO])


# ---------------------------------------------------------------------------
# Parameter init (logical shapes exactly match the PyTorch module)
# ---------------------------------------------------------------------------
def init_params(key, in_feats, out_feats, num_heads, seq_max_len):
    H, F = num_heads, out_feats
    D = F * H * seq_max_len
    ks = jax.random.split(key, 20)
    p = {
        "gat_W": jax.random.normal(ks[0], (in_feats, H * F), jnp.float32) * 0.1,
        "attn_l": jax.random.normal(ks[1], (H, F), jnp.float32) * 0.1,
        "attn_r": jax.random.normal(ks[2], (H, F), jnp.float32) * 0.1,
        "gat_bias": jax.random.normal(ks[3], (H * F,), jnp.float32) * 0.1,
    }
    dims = [D, 180, 150, 128, 80, 64, 32, 1]
    for i in range(7):
        scale = 1.0 / float(dims[i]) ** 0.5
        p[f"W{i + 1}"] = jax.random.normal(ks[4 + i], (dims[i], dims[i + 1]), jnp.float32) * scale
        p[f"b{i + 1}"] = jax.random.normal(ks[11 + i], (1, dims[i + 1]), jnp.float32) * 0.01
    p["Wt"] = jax.random.normal(ks[18], (D, 1), jnp.float32) * 0.1
    return p


def prepare_params(params, *, in_feats, out_feats, num_heads, seq_max_len, num_paths):
    """One-time weight repacking: fold attn_l/attn_r through gat_W, build the
    combined GAT weight / block-diagonal mask, merge W7 with linear_trans and
    store every matmul weight in bf16 (f32 accumulation in the kernel)."""
    f32, bf16 = jnp.float32, jnp.bfloat16
    Cin, F, H, S, N = in_feats, out_feats, num_heads, seq_max_len, num_paths
    SH, SHN, SHF = S * H, S * H * N, S * H * F

    Wg = params["gat_W"].astype(f32).reshape(Cin, H, F)
    wl = jnp.einsum("chf,hf->ch", Wg, params["attn_l"].astype(f32))   # (Cin, H)
    wr = jnp.einsum("chf,hf->ch", Wg, params["attn_r"].astype(f32))   # (Cin, H)
    eyeS = jnp.eye(S, dtype=f32)
    WZ = jnp.einsum("pq,chf->pcqhf", eyeS, Wg).reshape(S * Cin, SHF)
    WR = jnp.broadcast_to(jnp.einsum("pq,ch->pcqh", eyeS, wr)[..., None],
                          (S, Cin, S, H, N)).reshape(S * Cin, SHN)
    prep = {
        "W_gat": jnp.concatenate([WZ, WR], axis=1).astype(bf16),       # (S*Cin, SHF+SHN)
        "WL_pattern": jnp.broadcast_to(wl[:, None, :, None],
                                       (Cin, S, H, N)).reshape(Cin, SHN).astype(f32),
        "bias_row": jnp.tile(params["gat_bias"].astype(f32).reshape(1, H * F), (1, S)),
        "bd": (jnp.repeat(jnp.arange(SH), N)[:, None]
               == jnp.repeat(jnp.arange(SH), F)[None, :]).astype(bf16),  # (SHN, SHF)
    }
    for i in range(1, 7):
        prep[f"W{i}"] = params[f"W{i}"].astype(bf16)
    # merged last layer: rows [0:D] = linear_trans (Wt), rows [D:D+32] = W7
    prep["W7t"] = jnp.concatenate([params["Wt"].astype(f32),
                                   params["W7"].astype(f32)], axis=0).astype(bf16)
    widths = [180, 150, 128, 80, 64, 32, 1]
    ball = jnp.zeros((8, 180), f32)
    for i, wd in enumerate(widths):
        ball = ball.at[i, :wd].set(params[f"b{i + 1}"].reshape(-1).astype(f32))
    prep["bias_all"] = ball
    return prep


# ---------------------------------------------------------------------------
# Full forward pass: one fused pallas_call + tiny unpack in JAX
# ---------------------------------------------------------------------------
@functools.partial(jax.jit, static_argnames=("num_heads", "out_feats", "seq_max_len"))
def route_learning_forward(prep, embedding, adj, M, odNum, edge_src, edge_dst,
                           *, num_heads, out_feats, seq_max_len):
    H, F, S = num_heads, out_feats, seq_max_len
    N, _, Cin = embedding.shape
    O = M.shape[0]
    SHN, SHF = S * H * N, S * H * F
    LO = max(128, O + 1)
    LA = max(SHN, SHF, LO)
    f32 = jnp.float32

    # tiny per-call input prep (a few KB of XLA work feeding the kernel)
    emb = embedding.astype(f32)
    x_nodes = emb.reshape(N, S * Cin).astype(jnp.bfloat16)              # (N, S*Cin)
    x_t = jnp.broadcast_to(jnp.transpose(emb, (2, 1, 0))[:, :, None, :],
                           (Cin, S, H, N)).reshape(Cin, SHN)            # x^T, (s,h,src) lanes
    adj_big = jnp.tile(adj.astype(f32), (1, S * H))                     # (N, SHN)
    mt = jnp.zeros((N, LA), f32).at[:, :O].set(M.T.astype(f32))
    od = jnp.zeros((1, LA), f32).at[:, :O].set(odNum.astype(f32).reshape(1, O))

    def lanepad(a):
        pad = LA - a.shape[1]
        return a if pad == 0 else jnp.pad(a, ((0, 0), (0, pad)))

    # pack all small f32 operands into ONE aux array (one DMA descriptor)
    aux = jnp.concatenate([lanepad(x_t), lanepad(prep["WL_pattern"]),
                           lanepad(adj_big), mt, od, lanepad(prep["bias_row"])], axis=0)
    pad_rows = (-aux.shape[0]) % 8
    if pad_rows:
        aux = jnp.pad(aux, ((0, pad_rows), (0, 0)))

    mlp_ws = [prep[f"W{i}"] for i in range(1, 7)] + [prep["W7t"]]
    flops = (2 * N * (S * Cin) * (SHF + SHN)           # GAT projection + er
             + 2 * N * SHN * 2 * SHF                   # attention aggregation + denominators
             + sum(2 * N * w.shape[0] * w.shape[1] for w in mlp_ws))
    transc = N * SHN + N
    nbytes = (x_nodes.size * 2 + aux.size * 4 + prep["W_gat"].size * 2
              + prep["bd"].size * 2 + sum(w.size * 2 for w in mlp_ws)
              + prep["bias_all"].size * 4 + N * LO * 4)

    kernel = functools.partial(_fused_kernel, N=N, S=S, H=H, F=F, Cin=Cin, O=O, LO=LO)
    slab = pl.pallas_call(
        kernel,
        out_shape=jax.ShapeDtypeStruct((N, LO), jnp.float32),
        compiler_params=pltpu.CompilerParams(vmem_limit_bytes=32 * 1024 * 1024),
        cost_estimate=pl.CostEstimate(flops=flops, transcendentals=transc,
                                      bytes_accessed=nbytes),
    )(x_nodes, aux, prep["W_gat"], prep["bd"],
      prep["W1"], prep["W2"], prep["W3"], prep["W4"], prep["W5"], prep["W6"],
      prep["W7t"], prep["bias_all"])

    probT = slab[:, :O]                                 # prob[od, path] transposed
    predFlow = slab[:, O:O + 1]                         # (N_path, 1)
    selectProb = probT[edge_src, edge_dst][:, None]     # per select- edge (E, 1)
    return predFlow, selectProb


# TODO(synk): DGL graph bookkeeping (metapath_reachable_graph, add_self_loop,
# edge_type_subgraph) has no Pallas equivalent; it is reproduced by the dense
# adjacency / membership matrices built below in plain JAX.

if __name__ == "__main__":
    in_feats, out_feats, num_heads, seq_max_len = 16, 8, 2, 8
    P, O = 8, 4  # path nodes, od nodes

    key = jax.random.PRNGKey(0)
    k_emb, k_od, k_par = jax.random.split(key, 3)

    params = init_params(k_par, in_feats, out_feats, num_heads, seq_max_len)
    prep = prepare_params(params, in_feats=in_feats, out_feats=out_feats,
                          num_heads=num_heads, seq_max_len=seq_max_len, num_paths=P)

    # node features on 'path' nodes, demand on 'od' nodes
    embedding = jax.random.normal(k_emb, (P, seq_max_len, in_feats), jnp.float32)
    odNum = jnp.abs(jax.random.normal(k_od, (O, 1), jnp.float32)) * 10.0

    # select- edges: path p -> od p//2 ; select+ edges are the reverse pairs
    edge_src = jnp.arange(P, dtype=jnp.int32)
    edge_dst = jnp.array([0, 0, 1, 1, 2, 2, 3, 3], dtype=jnp.int32)
    M = (edge_dst[None, :] == jnp.arange(O)[:, None]).astype(jnp.float32)   # (O, P)

    # metapath-reachable path->path graph (binary) + extra self-loop from add_self_loop
    reach = (M.T @ M > 0).astype(jnp.float32)
    adj = reach + jnp.eye(P, dtype=jnp.float32)       # adj[dst, src] edge counts

    predFlow, selectProb = route_learning_forward(
        prep, embedding, adj, M, odNum, edge_src, edge_dst,
        num_heads=num_heads, out_feats=out_feats, seq_max_len=seq_max_len)
    jax.block_until_ready((predFlow, selectProb))

    assert predFlow.shape == (P, 1) and selectProb.shape == (P, 1)
    assert bool(jnp.all(jnp.isfinite(predFlow))) and bool(jnp.all(jnp.isfinite(selectProb)))
    # flow conservation: total predicted path flow == total od demand
    total_flow = float(jnp.sum(predFlow))
    total_od = float(jnp.sum(odNum))
    assert abs(total_flow - total_od) <= 0.05 * max(1.0, abs(total_od)), (total_flow, total_od)
    print("KERNEL_OK")
</pallas_src>

<mosaic_0001>
module attributes {stable_mosaic.version = 11 : i64} {
  func.func @_fused_kernel(%arg0: memref<8x128xbf16, #tpu.memory_space<vmem>>, %arg1: memref<56x128xf32, #tpu.memory_space<vmem>>, %arg2: memref<128x256xbf16, #tpu.memory_space<vmem>>, %arg3: memref<128x128xbf16, #tpu.memory_space<vmem>>, %arg4: memref<128x180xbf16, #tpu.memory_space<vmem>>, %arg5: memref<180x150xbf16, #tpu.memory_space<vmem>>, %arg6: memref<150x128xbf16, #tpu.memory_space<vmem>>, %arg7: memref<128x80xbf16, #tpu.memory_space<vmem>>, %arg8: memref<80x64xbf16, #tpu.memory_space<vmem>>, %arg9: memref<64x32xbf16, #tpu.memory_space<vmem>>, %arg10: memref<160x1xbf16, #tpu.memory_space<vmem>>, %arg11: memref<8x180xf32, #tpu.memory_space<vmem>>, %arg12: memref<8x128xf32, #tpu.memory_space<vmem>>) attributes {dimension_semantics = [], scalar_prefetch = 0 : i64, scratch_operands = 0 : i64, tpu.core_type = #tpu.core_type<tc>} {
    %c0 = arith.constant 0 : index
    %c0_0 = arith.constant 0 : index
    %0 = vector.load %arg0[%c0, %c0_0] : memref<8x128xbf16, #tpu.memory_space<vmem>>, vector<8x128xbf16>
    %c0_1 = arith.constant 0 : index
    %c0_2 = arith.constant 0 : index
    %1 = vector.load %arg2[%c0_1, %c0_2] : memref<128x256xbf16, #tpu.memory_space<vmem>>, vector<128x256xbf16>
    %cst = arith.constant dense<0.000000e+00> : vector<8x256xf32>
    %2 = tpu.matmul %0, %1, %cst {dimension_numbers = #tpu.dot_dimension_numbers<[1], [0], [0], [1], [0, 0, 1, 1], [], []>} : vector<8x128xbf16>, vector<128x256xbf16>, vector<8x256xf32> -> vector<8x256xf32>
    %3 = vector.extract_strided_slice %2 {offsets = [0, 0], sizes = [8, 128], strides = [1, 1]} : vector<8x256xf32> to vector<8x128xf32>
    %4 = vector.extract_strided_slice %2 {offsets = [0, 128], sizes = [8, 128], strides = [1, 1]} : vector<8x256xf32> to vector<8x128xf32>
    %c0_3 = arith.constant 0 : index
    %c0_4 = arith.constant 0 : index
    %5 = vector.load %arg1[%c0_3, %c0_4] : memref<56x128xf32, #tpu.memory_space<vmem>>, vector<16x128xf32>
    %c16 = arith.constant 16 : index
    %c0_5 = arith.constant 0 : index
    %6 = vector.load %arg1[%c16, %c0_5] : memref<56x128xf32, #tpu.memory_space<vmem>>, vector<16x128xf32>
    %7 = arith.mulf %5, %6 : vector<16x128xf32>
    %cst_6 = arith.constant dense<0.000000e+00> : vector<128xf32>
    %8 = vector.multi_reduction <add>, %7, %cst_6 [0] : vector<16x128xf32> to vector<128xf32>
    %9 = vector.shape_cast %8 : vector<128xf32> to vector<1x128xf32>
    %c32 = arith.constant 32 : index
    %c0_7 = arith.constant 0 : index
    %10 = vector.load %arg1[%c32, %c0_7] : memref<56x128xf32, #tpu.memory_space<vmem>>, vector<8x128xf32>
    %11 = vector.broadcast %9 : vector<1x128xf32> to vector<8x128xf32>
    %12 = arith.addf %4, %11 : vector<8x128xf32>
    %cst_8 = arith.constant 0.000000e+00 : f32
    %13 = vector.broadcast %cst_8 : f32 to vector<8x128xf32>
    %14 = arith.cmpf ogt, %12, %13 : vector<8x128xf32>
    %cst_9 = arith.constant 2.000000e-01 : f32
    %15 = vector.broadcast %cst_9 : f32 to vector<8x128xf32>
    %16 = arith.mulf %15, %12 : vector<8x128xf32>
    %17 = arith.select %14, %12, %16 : vector<8x128xi1>, vector<8x128xf32>
    %cst_10 = arith.constant dense<0xFF800000> : vector<8xf32>
    %18 = vector.multi_reduction <maximumf>, %17, %cst_10 [1] : vector<8x128xf32> to vector<8xf32>
    %19 = vector.shape_cast %18 : vector<8xf32> to vector<8x1xf32>
    %20 = vector.broadcast %19 : vector<8x1xf32> to vector<8x128xf32>
    %21 = arith.subf %17, %20 : vector<8x128xf32>
    %22 = math.exp %21 : vector<8x128xf32>
    %23 = arith.mulf %10, %22 : vector<8x128xf32>
    %c0_11 = arith.constant 0 : index
    %c0_12 = arith.constant 0 : index
    %24 = vector.load %arg3[%c0_11, %c0_12] : memref<128x128xbf16, #tpu.memory_space<vmem>>, vector<128x128xbf16>
    %25 = arith.extf %24 : vector<128x128xbf16> to vector<128x128xf32>
    %26 = tpu.concatenate %3, %3, %3, %3, %3, %3, %3, %3, %3, %3, %3, %3, %3, %3, %3, %3 in 0 : vector<8x128xf32>, vector<8x128xf32>, vector<8x128xf32>, vector<8x128xf32>, vector<8x128xf32>, vector<8x128xf32>, vector<8x128xf32>, vector<8x128xf32>, vector<8x128xf32>, vector<8x128xf32>, vector<8x128xf32>, vector<8x128xf32>, vector<8x128xf32>, vector<8x128xf32>, vector<8x128xf32>, vector<8x128xf32> -> vector<128x128xf32>
    %27 = arith.mulf %26, %25 : vector<128x128xf32>
    %28 = tpu.concatenate %27, %25 in 1 : vector<128x128xf32>, vector<128x128xf32> -> vector<128x256xf32>
    %cst_13 = arith.constant dense<0.000000e+00> : vector<8x256xf32>
    %29 = tpu.matmul %23, %28, %cst_13 {dimension_numbers = #tpu.dot_dimension_numbers<[1], [0], [0], [1], [0, 0, 1, 1], [], []>} : vector<8x128xf32>, vector<128x256xf32>, vector<8x256xf32> -> vector<8x256xf32>
    %30 = vector.extract_strided_slice %29 {offsets = [0, 128], sizes = [8, 128], strides = [1, 1]} : vector<8x256xf32> to vector<8x128xf32>
    %cst_14 = arith.constant 1.000000e-30 : f32
    %31 = vector.broadcast %cst_14 : f32 to vector<8x128xf32>
    %32 = arith.maximumf %30, %31 : vector<8x128xf32>
    %c49 = arith.constant 49 : index
    %c0_15 = arith.constant 0 : index
    %33 = vector.load %arg1[%c49, %c0_15] : memref<56x128xf32, #tpu.memory_space<vmem>>, vector<1x128xf32>
    %34 = vector.extract_strided_slice %29 {offsets = [0, 0], sizes = [8, 128], strides = [1, 1]} : vector<8x256xf32> to vector<8x128xf32>
    %35 = arith.divf %34, %32 : vector<8x128xf32>
    %36 = vector.broadcast %33 : vector<1x128xf32> to vector<8x128xf32>
    %37 = arith.addf %35, %36 : vector<8x128xf32>
    %38 = arith.truncf %37 : vector<8x128xf32> to vector<8x128xbf16>
    %c0_16 = arith.constant 0 : index
    %c0_17 = arith.constant 0 : index
    %39 = vector.load %arg4[%c0_16, %c0_17] : memref<128x180xbf16, #tpu.memory_space<vmem>>, vector<128x180xbf16>
    %cst_18 = arith.constant dense<0.000000e+00> : vector<8x180xf32>
    %40 = tpu.matmul %38, %39, %cst_18 {dimension_numbers = #tpu.dot_dimension_numbers<[1], [0], [0], [1], [0, 0, 1, 1], [], []>} : vector<8x128xbf16>, vector<128x180xbf16>, vector<8x180xf32> -> vector<8x180xf32>
    %c0_19 = arith.constant 0 : index
    %c0_20 = arith.constant 0 : index
    %41 = vector.load %arg11[%c0_19, %c0_20] : memref<8x180xf32, #tpu.memory_space<vmem>>, vector<1x180xf32>
    %42 = vector.broadcast %41 : vector<1x180xf32> to vector<8x180xf32>
    %43 = arith.addf %40, %42 : vector<8x180xf32>
    %cst_21 = arith.constant 0.000000e+00 : f32
    %44 = vector.broadcast %cst_21 : f32 to vector<8x180xf32>
    %45 = arith.maximumf %43, %44 : vector<8x180xf32>
    %46 = arith.truncf %45 : vector<8x180xf32> to vector<8x180xbf16>
    %c0_22 = arith.constant 0 : index
    %c0_23 = arith.constant 0 : index
    %47 = vector.load %arg5[%c0_22, %c0_23] : memref<180x150xbf16, #tpu.memory_space<vmem>>, vector<180x150xbf16>
    %cst_24 = arith.constant dense<0.000000e+00> : vector<8x150xf32>
    %48 = tpu.matmul %46, %47, %cst_24 {dimension_numbers = #tpu.dot_dimension_numbers<[1], [0], [0], [1], [0, 0, 1, 1], [], []>} : vector<8x180xbf16>, vector<180x150xbf16>, vector<8x150xf32> -> vector<8x150xf32>
    %c1 = arith.constant 1 : index
    %c0_25 = arith.constant 0 : index
    %49 = vector.load %arg11[%c1, %c0_25] : memref<8x180xf32, #tpu.memory_space<vmem>>, vector<1x150xf32>
    %50 = vector.broadcast %49 : vector<1x150xf32> to vector<8x150xf32>
    %51 = arith.addf %48, %50 : vector<8x150xf32>
    %cst_26 = arith.constant 0.000000e+00 : f32
    %52 = vector.broadcast %cst_26 : f32 to vector<8x150xf32>
    %53 = arith.maximumf %51, %52 : vector<8x150xf32>
    %54 = arith.truncf %53 : vector<8x150xf32> to vector<8x150xbf16>
    %c0_27 = arith.constant 0 : index
    %c0_28 = arith.constant 0 : index
    %55 = vector.load %arg6[%c0_27, %c0_28] : memref<150x128xbf16, #tpu.memory_space<vmem>>, vector<150x128xbf16>
    %cst_29 = arith.constant dense<0.000000e+00> : vector<8x128xf32>
    %56 = tpu.matmul %54, %55, %cst_29 {dimension_numbers = #tpu.dot_dimension_numbers<[1], [0], [0], [1], [0, 0, 1, 1], [], []>} : vector<8x150xbf16>, vector<150x128xbf16>, vector<8x128xf32> -> vector<8x128xf32>
    %c2 = arith.constant 2 : index
    %c0_30 = arith.constant 0 : index
    %57 = vector.load %arg11[%c2, %c0_30] : memref<8x180xf32, #tpu.memory_space<vmem>>, vector<1x128xf32>
    %58 = vector.broadcast %57 : vector<1x128xf32> to vector<8x128xf32>
    %59 = arith.addf %56, %58 : vector<8x128xf32>
    %cst_31 = arith.constant 0.000000e+00 : f32
    %60 = vector.broadcast %cst_31 : f32 to vector<8x128xf32>
    %61 = arith.maximumf %59, %60 : vector<8x128xf32>
    %62 = arith.truncf %61 : vector<8x128xf32> to vector<8x128xbf16>
    %c0_32 = arith.constant 0 : index
    %c0_33 = arith.constant 0 : index
    %63 = vector.load %arg7[%c0_32, %c0_33] : memref<128x80xbf16, #tpu.memory_space<vmem>>, vector<128x80xbf16>
    %cst_34 = arith.constant dense<0.000000e+00> : vector<8x80xf32>
    %64 = tpu.matmul %62, %63, %cst_34 {dimension_numbers = #tpu.dot_dimension_numbers<[1], [0], [0], [1], [0, 0, 1, 1], [], []>} : vector<8x128xbf16>, vector<128x80xbf16>, vector<8x80xf32> -> vector<8x80xf32>
    %c3 = arith.constant 3 : index
    %c0_35 = arith.constant 0 : index
    %65 = vector.load %arg11[%c3, %c0_35] : memref<8x180xf32, #tpu.memory_space<vmem>>, vector<1x80xf32>
    %66 = vector.broadcast %65 : vector<1x80xf32> to vector<8x80xf32>
    %67 = arith.addf %64, %66 : vector<8x80xf32>
    %cst_36 = arith.constant 0.000000e+00 : f32
    %68 = vector.broadcast %cst_36 : f32 to vector<8x80xf32>
    %69 = arith.maximumf %67, %68 : vector<8x80xf32>
    %70 = arith.truncf %69 : vector<8x80xf32> to vector<8x80xbf16>
    %c0_37 = arith.constant 0 : index
    %c0_38 = arith.constant 0 : index
    %71 = vector.load %arg8[%c0_37, %c0_38] : memref<80x64xbf16, #tpu.memory_space<vmem>>, vector<80x64xbf16>
    %cst_39 = arith.constant dense<0.000000e+00> : vector<8x64xf32>
    %72 = tpu.matmul %70, %71, %cst_39 {dimension_numbers = #tpu.dot_dimension_numbers<[1], [0], [0], [1], [0, 0, 1, 1], [], []>} : vector<8x80xbf16>, vector<80x64xbf16>, vector<8x64xf32> -> vector<8x64xf32>
    %c4 = arith.constant 4 : index
    %c0_40 = arith.constant 0 : index
    %73 = vector.load %arg11[%c4, %c0_40] : memref<8x180xf32, #tpu.memory_space<vmem>>, vector<1x64xf32>
    %74 = vector.broadcast %73 : vector<1x64xf32> to vector<8x64xf32>
    %75 = arith.addf %72, %74 : vector<8x64xf32>
    %cst_41 = arith.constant 0.000000e+00 : f32
    %76 = vector.broadcast %cst_41 : f32 to vector<8x64xf32>
    %77 = arith.maximumf %75, %76 : vector<8x64xf32>
    %78 = arith.truncf %77 : vector<8x64xf32> to vector<8x64xbf16>
    %c0_42 = arith.constant 0 : index
    %c0_43 = arith.constant 0 : index
    %79 = vector.load %arg9[%c0_42, %c0_43] : memref<64x32xbf16, #tpu.memory_space<vmem>>, vector<64x32xbf16>
    %cst_44 = arith.constant dense<0.000000e+00> : vector<8x32xf32>
    %80 = tpu.matmul %78, %79, %cst_44 {dimension_numbers = #tpu.dot_dimension_numbers<[1], [0], [0], [1], [0, 0, 1, 1], [], []>} : vector<8x64xbf16>, vector<64x32xbf16>, vector<8x32xf32> -> vector<8x32xf32>
    %c5 = arith.constant 5 : index
    %c0_45 = arith.constant 0 : index
    %81 = vector.load %arg11[%c5, %c0_45] : memref<8x180xf32, #tpu.memory_space<vmem>>, vector<1x32xf32>
    %82 = vector.broadcast %81 : vector<1x32xf32> to vector<8x32xf32>
    %83 = arith.addf %80, %82 : vector<8x32xf32>
    %cst_46 = arith.constant 0.000000e+00 : f32
    %84 = vector.broadcast %cst_46 : f32 to vector<8x32xf32>
    %85 = arith.maximumf %83, %84 : vector<8x32xf32>
    %86 = tpu.concatenate %37, %85 in 1 : vector<8x128xf32>, vector<8x32xf32> -> vector<8x160xf32>
    %87 = arith.truncf %86 : vector<8x160xf32> to vector<8x160xbf16>
    %c0_47 = arith.constant 0 : index
    %c0_48 = arith.constant 0 : index
    %88 = vector.load %arg10[%c0_47, %c0_48] : memref<160x1xbf16, #tpu.memory_space<vmem>>, vector<160x1xbf16>
    %cst_49 = arith.constant dense<0.000000e+00> : vector<8x1xf32>
    %89 = tpu.matmul %87, %88, %cst_49 {dimension_numbers = #tpu.dot_dimension_numbers<[1], [0], [0], [1], [0, 0, 1, 1], [], []>} : vector<8x160xbf16>, vector<160x1xbf16>, vector<8x1xf32> -> vector<8x1xf32>
    %c6 = arith.constant 6 : index
    %c0_50 = arith.constant 0 : index
    %90 = vector.load %arg11[%c6, %c0_50] : memref<8x180xf32, #tpu.memory_space<vmem>>, vector<1x1xf32>
    %91 = vector.broadcast %90 : vector<1x1xf32> to vector<8x1xf32>
    %92 = arith.addf %89, %91 : vector<8x1xf32>
    %c40 = arith.constant 40 : index
    %c0_51 = arith.constant 0 : index
    %93 = vector.load %arg1[%c40, %c0_51] : memref<56x128xf32, #tpu.memory_space<vmem>>, vector<8x128xf32>
    %c48 = arith.constant 48 : index
    %c0_52 = arith.constant 0 : index
    %94 = vector.load %arg1[%c48, %c0_52] : memref<56x128xf32, #tpu.memory_space<vmem>>, vector<1x128xf32>
    %cst_53 = arith.constant 0.000000e+00 : f32
    %95 = vector.broadcast %cst_53 : f32 to vector<8x128xf32>
    %96 = arith.cmpf ogt, %93, %95 : vector<8x128xf32>
    %cst_54 = arith.constant dense<0xFF800000> : vector<1xf32>
    %97 = vector.multi_reduction <maximumf>, %92, %cst_54 [0] : vector<8x1xf32> to vector<1xf32>
    %98 = vector.shape_cast %97 : vector<1xf32> to vector<1x1xf32>
    %99 = vector.broadcast %98 : vector<1x1xf32> to vector<8x1xf32>
    %100 = arith.subf %92, %99 : vector<8x1xf32>
    %101 = math.exp %100 : vector<8x1xf32>
    %cst_55 = arith.constant 0.000000e+00 : f32
    %102 = vector.shape_cast %101 : vector<8x1xf32> to vector<8x1xf32>
    %103 = vector.broadcast %102 : vector<8x1xf32> to vector<8x128xf32>
    %104 = vector.broadcast %cst_55 : f32 to vector<8x128xf32>
    %105 = arith.select %96, %103, %104 : vector<8x128xi1>, vector<8x128xf32>
    %cst_56 = arith.constant dense<0.000000e+00> : vector<128xf32>
    %106 = vector.multi_reduction <add>, %105, %cst_56 [0] : vector<8x128xf32> to vector<128xf32>
    %107 = vector.shape_cast %106 : vector<128xf32> to vector<1x128xf32>
    %cst_57 = arith.constant 1.000000e-30 : f32
    %108 = vector.broadcast %cst_57 : f32 to vector<1x128xf32>
    %109 = arith.maximumf %107, %108 : vector<1x128xf32>
    %110 = vector.broadcast %109 : vector<1x128xf32> to vector<8x128xf32>
    %111 = arith.divf %105, %110 : vector<8x128xf32>
    %112 = vector.broadcast %94 : vector<1x128xf32> to vector<8x128xf32>
    %113 = arith.mulf %111, %112 : vector<8x128xf32>
    %cst_58 = arith.constant dense<0.000000e+00> : vector<8xf32>
    %114 = vector.multi_reduction <add>, %113, %cst_58 [1] : vector<8x128xf32> to vector<8xf32>
    %115 = vector.shape_cast %114 : vector<8xf32> to vector<8x1xf32>
    %116 = tpu.iota {dimensions = array<i32: 1>} : vector<8x128xi32>
    %c4_i32 = arith.constant 4 : i32
    %117 = vector.broadcast %c4_i32 : i32 to vector<8x128xi32>
    %118 = arith.cmpi eq, %116, %117 : vector<8x128xi32>
    %119 = vector.shape_cast %115 : vector<8x1xf32> to vector<8x1xf32>
    %120 = vector.broadcast %119 : vector<8x1xf32> to vector<8x128xf32>
    %121 = arith.select %118, %120, %111 : vector<8x128xi1>, vector<8x128xf32>
    %c0_59 = arith.constant 0 : index
    %c0_60 = arith.constant 0 : index
    %122 = vector.load %arg12[%c0_59, %c0_60] : memref<8x128xf32, #tpu.memory_space<vmem>>, vector<8x128xf32>
    tpu.vector_store %arg12[%c0_59, %c0_60], %121 {strides = array<i32>} : memref<8x128xf32, #tpu.memory_space<vmem>>, vector<8x128xf32>,
    return
  }
}

</mosaic_0001>

<bundles_post_ra>
// kernel: tile.9
= control target key start
LH: loop header
LB: loop body
LE: loop exit
PB: predicated region body
PF: predicated region fallthrough
CT: control target
= control target key end

     0   :  { %vm6_vm0 = vcmask 1043458   ;;  %vm10_vm1 = vcmask 1045508   ;;  %vm14_vm2 = vcmask 1047558   ;;  %s19_s6 = smov 3  ;;  %s22_s7 = smov 12  ;;  %vm16_vm3 = vcmask 64512   ;;  %s736_s0 = inlined_call_operand.vmem [shape: f32[8,16,8], index: 0, kind: input, shape index: {}]   ;;  %s737_s1 = inlined_call_operand.vmem [shape: f32[8,128], index: 1, kind: output, shape index: {}]  }
   0x1   :  { %v348_v0 = vld [vmem:[%s736_s0 + $0xf] ss:$16 sm:%s19_s6]   ;;  %s27_s12 = smov 48  ;;  %s32_s13 = smov 192  ;;  %vm38_vm4 = vcmask 1048512   ;;  %vm60_vm5 = vcmask 982912  }
   0x2   :  { %v349_v1 = vld [vmem:[%s736_s0 + $0xf] ss:$16 sm:%s22_s7]   ;;  %s63_s18 = smov 3  ;;  %s66_s21 = smov 12  ;;  %vm82_vm6 = vcmask 917312   ;;  %vm104_vm7 = vcmask 851712  }
   0x3   :  { %v25_v2 = vsel %vm6_vm0, %v349_v1, %v348_v0  ;;  %v350_v3 = vld [vmem:[%s736_s0 + $0xf] ss:$16 sm:%s27_s12]   ;;  %v356_v6 = vld [vmem:[%s736_s0 + $0xd] ss:$16 sm:%s63_s18]   ;;  %s71_s22 = smov 48  ;;  %s76_s27 = smov 192 }
   0x4   :  { %v351_v4 = vld [vmem:[%s736_s0 + $0xf] ss:$16 sm:%s32_s13]   ;;  %v30_v5 = vsel %vm10_vm1, %v350_v3, %v25_v2  ;;  %v357_v8 = vld [vmem:[%s736_s0 + $0xd] ss:$16 sm:%s66_s21]   ;;  %s423_s28 = smov 120   ;;  %s41_s2 = smov 3 }
   0x5   :  { %v35_v7 = vsel %vm14_vm2, %v351_v4, %v30_v5  ;;  %v358_v9 = vld [vmem:[%s736_s0 + $0xd] ss:$16 sm:%s71_s22]   ;;  %v69_v10 = vsel %vm6_vm0, %v357_v8, %v356_v6  ;;  %s44_s3 = smov 12  ;;  %v352_v13 = vld [vmem:[%s736_s0 + $0xe] ss:$16 sm:%s41_s2]   ;;  %s49_s8 = smov 48 }
   0x6   :  { %36 = vrot.lane.b32.xlu0 %v35_v7, %s423_s28  ;;  %v359_v11 = vld [vmem:[%s736_s0 + $0xd] ss:$16 sm:%s76_s27]   ;;  %v74_v12 = vsel %vm10_vm1, %v358_v9, %v69_v10  ;;  %s54_s9 = smov 192  ;;  %s85_s14 = smov 3  ;;  %vm126_vm8 = vcmask 786112   ;;  %vm148_vm9 = vcmask 720512  }
   0x7   :  { %v353_v14 = vld [vmem:[%s736_s0 + $0xe] ss:$16 sm:%s44_s3]   ;;  %v79_v15 = vsel %vm14_vm2, %v359_v11, %v74_v12  ;;  %s424_s15 = smov 104   ;;  %v360_v20 = vld [vmem:[%s736_s0 + $0xc] ss:$16 sm:%s85_s14]   ;;  %s88_s18 = smov 12 }
   0x8   :  { %v47_v16 = vsel %vm6_vm0, %v353_v14, %v352_v13  ;;  %v354_v17 = vld [vmem:[%s736_s0 + $0xe] ss:$16 sm:%s49_s8]   ;;  %80 = vrot.lane.b32.xlu1 %v79_v15, %s424_s15  ;;  %s93_s19 = smov 48  ;;  %s98_s24 = smov 192  ;;  %vm170_vm10 = vcmask 654912   ;;  %vm192_vm11 = vcmask 589312  }
   0x9   :  { %v355_v18 = vld [vmem:[%s736_s0 + $0xe] ss:$16 sm:%s54_s9]   ;;  %v52_v19 = vsel %vm10_vm1, %v354_v17, %v47_v16  ;;  %v361_v22 = vld [vmem:[%s736_s0 + $0xc] ss:$16 sm:%s88_s18]   ;;  %s425_s25 = smov 112   ;;  %s107_s28 = smov 3 }
   0xa   :  { %v57_v21 = vsel %vm14_vm2, %v355_v18, %v52_v19  ;;  %v362_v23 = vld [vmem:[%s736_s0 + $0xc] ss:$16 sm:%s93_s19]   ;;  %v91_v24 = vsel %vm6_vm0, %v361_v22, %v360_v20  ;;  %s110_s29 = smov 12  ;;  %v364_v27 = vld [vmem:[%s736_s0 + $0xb] ss:$16 sm:%s107_s28]   ;;  %s115_s5 = smov 48 }
   0xb   :  { %58 = vrot.lane.b32.xlu0 %v57_v21, %s425_s25  ;;  %v363_v25 = vld [vmem:[%s736_s0 + $0xc] ss:$16 sm:%s98_s24]   ;;  %v96_v26 = vsel %vm10_vm1, %v362_v23, %v91_v24  ;;  %s120_s6 = smov 192  ;;  %s129_s11 = smov 3  ;;  %vm214_vm12 = vcmask 523712   ;;  %vm236_vm13 = vcmask 458112  }
   0xc   :  { %v365_v28 = vld [vmem:[%s736_s0 + $0xb] ss:$16 sm:%s110_s29]   ;;  %v101_v29 = vsel %vm14_vm2, %v363_v25, %v96_v26  ;;  %s426_s12 = smov 96   ;;  %v368_v34 = vld [vmem:[%s736_s0 + $0xa] ss:$16 sm:%s129_s11]   ;;  %s132_s15 = smov 12 }
   0xd   :  { %v113_v30 = vsel %vm6_vm0, %v365_v28, %v364_v27  ;;  %v366_v31 = vld [vmem:[%s736_s0 + $0xb] ss:$16 sm:%s115_s5]   ;;  %102 = vrot.lane.b32.xlu1 %v101_v29, %s426_s12  ;;  %s137_s16 = smov 48  ;;  %s142_s21 = smov 192  ;;  %vm258_vm14 = vcmask 392512   ;;  %vm280_vm15 = vcmask 326912  }
   0xe   :  { %v367_v32 = vld [vmem:[%s736_s0 + $0xb] ss:$16 sm:%s120_s6]   ;;  %v118_v33 = vsel %vm10_vm1, %v366_v31, %v113_v30  ;;  %v369_v36 = vld [vmem:[%s736_s0 + $0xa] ss:$16 sm:%s132_s15]   ;;  %s427_s22 = smov 88   ;;  %s151_s25 = smov 3 }
   0xf   :  { %v123_v35 = vsel %vm14_vm2, %v367_v32, %v118_v33  ;;  %v370_v37 = vld [vmem:[%s736_s0 + $0xa] ss:$16 sm:%s137_s16]   ;;  %v135_v38 = vsel %vm6_vm0, %v369_v36, %v368_v34  ;;  %s154_s26 = smov 12  ;;  %v372_v41 = vld [vmem:[%s736_s0 + $0x9] ss:$16 sm:%s151_s25]   ;;  %s159_s2 = smov 48 }
  0x10   :  { %124 = vrot.lane.b32.xlu0 %v123_v35, %s427_s22  ;;  %v371_v39 = vld [vmem:[%s736_s0 + $0xa] ss:$16 sm:%s142_s21]   ;;  %v140_v40 = vsel %vm10_vm1, %v370_v37, %v135_v38  ;;  %s164_s3 = smov 192  ;;  %s173_s8 = smov 3 }
  0x11   :  { %v373_v42 = vld [vmem:[%s736_s0 + $0x9] ss:$16 sm:%s154_s26]   ;;  %v145_v43 = vsel %vm14_vm2, %v371_v39, %v140_v40  ;;  %s428_s9 = smov 80   ;;  %v376_v48 = vld [vmem:[%s736_s0 + $0x8] ss:$16 sm:%s173_s8]   ;;  %s176_s12 = smov 12 }
  0x12   :  { %v157_v44 = vsel %vm6_vm0, %v373_v42, %v372_v41  ;;  %v374_v45 = vld [vmem:[%s736_s0 + $0x9] ss:$16 sm:%s159_s2]   ;;  %146 = vrot.lane.b32.xlu1 %v145_v43, %s428_s9  ;;  %s181_s13 = smov 48  ;;  %s186_s18 = smov 192 }
  0x13   :  { %v375_v46 = vld [vmem:[%s736_s0 + $0x9] ss:$16 sm:%s164_s3]   ;;  %v162_v47 = vsel %vm10_vm1, %v374_v45, %v157_v44  ;;  %v377_v50 = vld [vmem:[%s736_s0 + $0x8] ss:$16 sm:%s176_s12]   ;;  %s429_s19 = smov 72   ;;  %s195_s22 = smov 3 }
  0x14   :  { %v167_v49 = vsel %vm14_vm2, %v375_v46, %v162_v47  ;;  %v378_v51 = vld [vmem:[%s736_s0 + $0x8] ss:$16 sm:%s181_s13]   ;;  %v179_v52 = vsel %vm6_vm0, %v377_v50, %v376_v48  ;;  %s198_s23 = smov 12  ;;  %v380_v55 = vld [vmem:[%s736_s0 + $0x7] ss:$16 sm:%s195_s22]   ;;  %s203_s28 = smov 48 }
  0x15   :  { %168 = vrot.lane.b32.xlu0 %v167_v49, %s429_s19  ;;  %v379_v53 = vld [vmem:[%s736_s0 + $0x8] ss:$16 sm:%s186_s18]   ;;  %v184_v54 = vsel %vm10_vm1, %v378_v51, %v179_v52  ;;  %s208_s29 = smov 192  ;;  %s217_s5 = smov 3 }
  0x16   :  { %v381_v56 = vld [vmem:[%s736_s0 + $0x7] ss:$16 sm:%s198_s23]   ;;  %v189_v57 = vsel %vm14_vm2, %v379_v53, %v184_v54  ;;  %s430_s6 = smov 64   ;;  %v384_v62 = vld [vmem:[%s736_s0 + $0x6] ss:$16 sm:%s217_s5]   ;;  %s220_s9 = smov 12 }
  0x17   :  { %v201_v58 = vsel %vm6_vm0, %v381_v56, %v380_v55  ;;  %v382_v59 = vld [vmem:[%s736_s0 + $0x7] ss:$16 sm:%s203_s28]   ;;  %190 = vrot.lane.b32.xlu1 %v189_v57, %s430_s6  ;;  %s225_s10 = smov 48  ;;  %s230_s15 = smov 192 }
  0x18   :  { %v383_v60 = vld [vmem:[%s736_s0 + $0x7] ss:$16 sm:%s208_s29]   ;;  %v206_v61 = vsel %vm10_vm1, %v382_v59, %v201_v58  ;;  %v385_v0 = vld [vmem:[%s736_s0 + $0x6] ss:$16 sm:%s220_s9]   ;;  %s431_s16 = smov 56   ;;  %s239_s19 = smov 3 }
  0x19   :  { %v211_v63 = vsel %vm14_vm2, %v383_v60, %v206_v61  ;;  %v386_v1 = vld [vmem:[%s736_s0 + $0x6] ss:$16 sm:%s225_s10]   ;;  %v223_v2 = vsel %vm6_vm0, %v385_v0, %v384_v62  ;;  %s242_s20 = smov 12  ;;  %v388_v5 = vld [vmem:[%s736_s0 + $0x5] ss:$16 sm:%s239_s19]   ;;  %s247_s25 = smov 48 }
  0x1a   :  { %212 = vrot.lane.b32.xlu0 %v211_v63, %s431_s16  ;;  %v387_v3 = vld [vmem:[%s736_s0 + $0x6] ss:$16 sm:%s230_s15]   ;;  %v228_v4 = vsel %vm10_vm1, %v386_v1, %v223_v2  ;;  %s252_s26 = smov 192  ;;  %s261_s2 = smov 3 }
  0x1b   :  { %v389_v6 = vld [vmem:[%s736_s0 + $0x5] ss:$16 sm:%s242_s20]   ;;  %v233_v7 = vsel %vm14_vm2, %v387_v3, %v228_v4  ;;  %s432_s3 = smov 48   ;;  %v392_v12 = vld [vmem:[%s736_s0 + $0x4] ss:$16 sm:%s261_s2]   ;;  %s264_s6 = smov 12 }
  0x1c   :  { %v245_v8 = vsel %vm6_vm0, %v389_v6, %v388_v5  ;;  %v390_v9 = vld [vmem:[%s736_s0 + $0x5] ss:$16 sm:%s247_s25]   ;;  %234 = vrot.lane.b32.xlu1 %v233_v7, %s432_s3  ;;  %s269_s7 = smov 48  ;;  %s274_s12 = smov 192 }
  0x1d   :  { %v391_v10 = vld [vmem:[%s736_s0 + $0x5] ss:$16 sm:%s252_s26]   ;;  %v250_v11 = vsel %vm10_vm1, %v390_v9, %v245_v8  ;;  %v393_v14 = vld [vmem:[%s736_s0 + $0x4] ss:$16 sm:%s264_s6]   ;;  %s433_s13 = smov 40   ;;  %s283_s16 = smov 3 }
  0x1e   :  { %v255_v13 = vsel %vm14_vm2, %v391_v10, %v250_v11  ;;  %v394_v15 = vld [vmem:[%s736_s0 + $0x4] ss:$16 sm:%s269_s7]   ;;  %v267_v16 = vsel %vm6_vm0, %v393_v14, %v392_v12  ;;  %s286_s17 = smov 12  ;;  %v396_v19 = vld [vmem:[%s736_s0 + $0x3] ss:$16 sm:%s283_s16]   ;;  %s291_s22 = smov 48 }
  0x1f   :  { %256 = vrot.lane.b32.xlu0 %v255_v13, %s433_s13  ;;  %v395_v17 = vld [vmem:[%s736_s0 + $0x4] ss:$16 sm:%s274_s12]   ;;  %v272_v18 = vsel %vm10_vm1, %v394_v15, %v267_v16  ;;  %s296_s23 = smov 192  ;;  %s305_s28 = smov 3 }
  0x20   :  { %v397_v20 = vld [vmem:[%s736_s0 + $0x3] ss:$16 sm:%s286_s17]   ;;  %v277_v21 = vsel %vm14_vm2, %v395_v17, %v272_v18  ;;  %s434_s29 = smov 32   ;;  %v400_v26 = vld [vmem:[%s736_s0 + $0x2] ss:$16 sm:%s305_s28]   ;;  %s308_s3 = smov 12 }
  0x21   :  { %v289_v22 = vsel %vm6_vm0, %v397_v20, %v396_v19  ;;  %v398_v23 = vld [vmem:[%s736_s0 + $0x3] ss:$16 sm:%s291_s22]   ;;  %278 = vrot.lane.b32.xlu1 %v277_v21, %s434_s29  ;;  %s313_s4 = smov 48  ;;  %s318_s9 = smov 192 }
  0x22   :  { %v399_v24 = vld [vmem:[%s736_s0 + $0x3] ss:$16 sm:%s296_s23]   ;;  %v294_v25 = vsel %vm10_vm1, %v398_v23, %v289_v22  ;;  %v401_v28 = vld [vmem:[%s736_s0 + $0x2] ss:$16 sm:%s308_s3]   ;;  %s435_s10 = smov 24   ;;  %s327_s13 = smov 3 }
  0x23   :  { %v299_v27 = vsel %vm14_vm2, %v399_v24, %v294_v25  ;;  %v402_v29 = vld [vmem:[%s736_s0 + $0x2] ss:$16 sm:%s313_s4]   ;;  %v311_v30 = vsel %vm6_vm0, %v401_v28, %v400_v26  ;;  %s330_s14 = smov 12  ;;  %v404_v33 = vld [vmem:[%s736_s0 + $0x1] ss:$16 sm:%s327_s13]   ;;  %s335_s19 = smov 48 }
  0x24   :  { %300 = vrot.lane.b32.xlu0 %v299_v27, %s435_s10  ;;  %v403_v31 = vld [vmem:[%s736_s0 + $0x2] ss:$16 sm:%s318_s9]   ;;  %v316_v32 = vsel %vm10_vm1, %v402_v29, %v311_v30  ;;  %s340_s20 = smov 192  ;;  %s2_s25 = smov 3 }
  0x25   :  { %v405_v34 = vld [vmem:[%s736_s0 + $0x1] ss:$16 sm:%s330_s14]   ;;  %v321_v35 = vsel %vm14_vm2, %v403_v31, %v316_v32  ;;  %s436_s26 = smov 16   ;;  %s4_s27 = smov 12  ;;  %v3_v40 = vld [vmem:[%s736_s0] ss:$16 sm:%s2_s25]  }
  0x26   :  { %v333_v36 = vsel %vm6_vm0, %v405_v34, %v404_v33  ;;  %v406_v37 = vld [vmem:[%s736_s0 + $0x1] ss:$16 sm:%s335_s19]   ;;  %322 = vrot.lane.b32.xlu1 %v321_v35, %s436_s26  ;;  %s8_s28 = smov 48  ;;  %s12_s2 = smov 192 }
  0x27   :  { %v407_v38 = vld [vmem:[%s736_s0 + $0x1] ss:$16 sm:%s340_s20]   ;;  %v338_v39 = vsel %vm10_vm1, %v406_v37, %v333_v36  ;;  %v5_v42 = vld [vmem:[%s736_s0] ss:$16 sm:%s4_s27]   ;;  %s437_s7 = smov 8  }
  0x28   :  { %v343_v41 = vsel %vm14_vm2, %v407_v38, %v338_v39  ;;  %v9_v43 = vld [vmem:[%s736_s0] ss:$16 sm:%s8_s28]   ;;  %v7_v44 = vsel %vm6_vm0, %v5_v42, %v3_v40  ;;  %vm302_vm0 = vcmask 261312  }
  0x29   :  { %344 = vrot.lane.b32.xlu0 %v343_v41, %s437_s7  ;;  %v13_v45 = vld [vmem:[%s736_s0] ss:$16 sm:%s12_s2]   ;;  %v11_v46 = vsel %vm10_vm1, %v9_v43, %v7_v44  ;;  %vm324_vm1 = vcmask 195712  }
  0x2a   :  { %v15_v47 = vsel %vm14_vm2, %v13_v45, %v11_v46  ;;  %vm346_vm2 = vcmask 130112  }
  0x2b   :  { %17 = vst.msk [vmem:[%s737_s1] sm:$0xff] %vm16_vm3, %v15_v47  }
  0x78   :  { %v37_v48 = vpop.permute.xlu0 %36  }
  0x79   :  { %39 = vst.msk [vmem:[%s737_s1] sm:$0xff] %vm38_vm4, %v37_v48  }
  0x7a   :  { %v81_v49 = vpop.permute.xlu1 %80  }
  0x7d   :  { %v59_v50 = vpop.permute.xlu0 %58  }
  0x7e   :  { %61 = vst.msk [vmem:[%s737_s1] sm:$0xff] %vm60_vm5, %v59_v50  }
  0x7f   :  { %83 = vst.msk [vmem:[%s737_s1] sm:$0xff] %vm82_vm6, %v81_v49   ;;  %v103_v51 = vpop.permute.xlu1 %102  }
  0x80   :  { %105 = vst.msk [vmem:[%s737_s1] sm:$0xff] %vm104_vm7, %v103_v51  }
  0x82   :  { %v125_v52 = vpop.permute.xlu0 %124  }
  0x83   :  { %127 = vst.msk [vmem:[%s737_s1] sm:$0xff] %vm126_vm8, %v125_v52  }
  0x84   :  { %v147_v53 = vpop.permute.xlu1 %146  }
  0x85   :  { %149 = vst.msk [vmem:[%s737_s1] sm:$0xff] %vm148_vm9, %v147_v53  }
  0x87   :  { %v169_v54 = vpop.permute.xlu0 %168  }
  0x88   :  { %171 = vst.msk [vmem:[%s737_s1] sm:$0xff] %vm170_vm10, %v169_v54  }
  0x89   :  { %v191_v55 = vpop.permute.xlu1 %190  }
  0x8a   :  { %193 = vst.msk [vmem:[%s737_s1] sm:$0xff] %vm192_vm11, %v191_v55  }
  0x8c   :  { %v213_v56 = vpop.permute.xlu0 %212  }
  0x8d   :  { %215 = vst.msk [vmem:[%s737_s1] sm:$0xff] %vm214_vm12, %v213_v56  }
  0x8e   :  { %v235_v57 = vpop.permute.xlu1 %234  }
  0x8f   :  { %237 = vst.msk [vmem:[%s737_s1] sm:$0xff] %vm236_vm13, %v235_v57  }
  0x91   :  { %v257_v58 = vpop.permute.xlu0 %256  }
  0x92   :  { %259 = vst.msk [vmem:[%s737_s1] sm:$0xff] %vm258_vm14, %v257_v58  }
  0x93   :  { %v279_v59 = vpop.permute.xlu1 %278  }
  0x94   :  { %281 = vst.msk [vmem:[%s737_s1] sm:$0xff] %vm280_vm15, %v279_v59  }
  0x96   :  { %v301_v60 = vpop.permute.xlu0 %300  }
  0x97   :  { %303 = vst.msk [vmem:[%s737_s1] sm:$0xff] %vm302_vm0, %v301_v60  }
  0x98   :  { %v323_v61 = vpop.permute.xlu1 %322  }
  0x99   :  { %325 = vst.msk [vmem:[%s737_s1] sm:$0xff] %vm324_vm1, %v323_v61  }
  0x9b   :  { %v345_v62 = vpop.permute.xlu0 %344  }
  0x9c   :  { %347 = vst.msk [vmem:[%s737_s1] sm:$0xff] %vm346_vm2, %v345_v62  }

// kernel: route_learning_forward.1
= control target key start
LH: loop header
LB: loop body
LE: loop exit
PB: predicated region body
PF: predicated region fallthrough
CT: control target
= control target key end

     0   :  { %v1634_v1 = vmov 0   ;;  %vm641_vm1 = vcmask 1041408   ;;  %vm637_vm2 = vcmask 424960   ;;  %vm774_vm3 = vcmask 1042432   ;;  %s2106_s2 = inlined_call_operand.vmem [shape: bf16[128,256], index: 2, kind: input, shape index: {}]   ;;  %s2107_s0 = inlined_call_operand.vmem [shape: bf16[8,128], index: 0, kind: input, shape index: {}]   ;;  %s2108_s3 = inlined_call_operand.vmem [shape: bf16[128,128], index: 3, kind: input, shape index: {}]   ;;  %s2109_s1 = inlined_call_operand.vmem [shape: f32[56,128], index: 1, kind: input, shape index: {}]   ;;  %s2110_s4 = inlined_call_operand.vmem [shape: bf16[128,180], index: 4, kind: input, shape index: {}]   ;;  %s2111_s5 = inlined_call_operand.vmem [shape: bf16[180,150], index: 5, kind: input, shape index: {}]   ;;  %s2112_s6 = inlined_call_operand.vmem [shape: bf16[150,128], index: 6, kind: input, shape index: {}]   ;;  %s2113_s11 = inlined_call_operand.vmem [shape: f32[8,180], index: 11, kind: input, shape index: {}]   ;;  %s2114_s7 = inlined_call_operand.vmem [shape: bf16[128,80], index: 7, kind: input, shape index: {}]   ;;  %s2115_s8 = inlined_call_operand.vmem [shape: bf16[80,64], index: 8, kind: input, shape index: {}]   ;;  %s2116_s9 = inlined_call_operand.vmem [shape: bf16[64,32], index: 9, kind: input, shape index: {}]   ;;  %s2117_s10 = inlined_call_operand.vmem [shape: bf16[160,1], index: 10, kind: input, shape index: {}]   ;;  %s2118_s12 = inlined_call_operand.vmem [shape: f32[8,128], index: 12, kind: output, shape index: {}]  }
   0x1   :  { %v1506_v0 = vld [vmem:[%s2106_s2 + $0x4] ss:$8 sps:$4 sm:$0xff]   ;;  %171 = vmatprep.mubr.bf16.mxu0 %v1634_v1  ;;  %1505 = vset.pattern.permute.xlu0 %v1634_v1  ;;  %v1508_v2 = vld [vmem:[%s2106_s2] ss:$8 sps:$4 sm:$0xff]   ;;  %v1509_v3 = vld [vmem:[%s2106_s2 + $0x14] ss:$8 sps:$4 sm:$0xff]  }
   0x2   :  { %139 = vmatprep.subr.bf16.mxu0 %v1506_v0  ;;  %v1511_v4 = vld [vmem:[%s2106_s2 + $0x10] ss:$8 sps:$4 sm:$0xff]   ;;  %v1512_v5 = vld [vmem:[%s2106_s2 + $0x24] ss:$8 sps:$4 sm:$0xff]   ;;  %v1514_v6 = vld [vmem:[%s2106_s2 + $0x20] ss:$8 sps:$4 sm:$0xff]  }
   0x3   :  { %140 = vmatpush1.bf16.msra.mxu0 %v1508_v2  ;;  %v1515_v7 = vld [vmem:[%s2106_s2 + $0x34] ss:$8 sps:$4 sm:$0xff]   ;;  %v1517_v8 = vld [vmem:[%s2106_s2 + $0x30] ss:$8 sps:$4 sm:$0xff]   ;;  %v1518_v9 = vld [vmem:[%s2106_s2 + $0x44] ss:$8 sps:$4 sm:$0xff]  }
   0x4   :  { %141 = vmatprep.subr.bf16.mxu0 %v1509_v3  ;;  %v1520_v10 = vld [vmem:[%s2106_s2 + $0x40] ss:$8 sps:$4 sm:$0xff]   ;;  %v1521_v11 = vld [vmem:[%s2106_s2 + $0x54] ss:$8 sps:$4 sm:$0xff]   ;;  %v1523_v12 = vld [vmem:[%s2106_s2 + $0x50] ss:$8 sps:$4 sm:$0xff]  }
   0x5   :  { %v1524_v13 = vld [vmem:[%s2106_s2 + $0x64] ss:$8 sps:$4 sm:$0xff]   ;;  %v1526_v14 = vld [vmem:[%s2106_s2 + $0x60] ss:$8 sps:$4 sm:$0xff]   ;;  %v1527_v15 = vld [vmem:[%s2106_s2 + $0x74] ss:$8 sps:$4 sm:$0xff]  }
   0x6   :  { %v1529_v16 = vld [vmem:[%s2106_s2 + $0x70] ss:$8 sps:$4 sm:$0xff]   ;;  %v42_v17 = vld [vmem:[%s2107_s0] sm:$0xf]  ;;  %v181_v20 = vld [vmem:[%s2109_s1 + $0x8] sm:$0xff]  ;;  %vm770_vm4 = vcmask 179200  }
   0x7   :  { %142 = vmatpush1.bf16.msra.mxu0 %v1511_v4  ;;  %v1366_v18 = vld [vmem:[%s2108_s3] sm:$0xff]   ;;  %v182_v21 = vld [vmem:[%s2109_s1 + $0x10] sm:$0xff]  ;;  %v183_v22 = vld [vmem:[%s2109_s1 + $0x18] sm:$0xff]  ;;  %vm1636_vm5 = vmmov 0   ;;  %vm968_vm6 = vcmask 654336   ;;  %vm1047_vm7 = vcmask 523264  }
   0x8   :  { %143 = vmatprep.subr.bf16.mxu0 %v1512_v5  ;;  %1471 = vmatprep.subr.bf16.mxu1 %v1366_v18  ;;  %v180_v19 = vld [vmem:[%s2109_s1] sm:$0xff]  ;;  %v185_v24 = vmul.f32 %v183_v22, %v181_v20  ;;  %v1397_v31 = vld [vmem:[%s2108_s3 + $0x8] sm:$0xff]   ;;  %v1398_v32 = vld [vmem:[%s2108_s3 + $0x10] sm:$0xff]   ;;  %v1367_v34 = vunpack.c.l.bf16 %v1366_v18  ;;  %v1368_v37 = vunpack.c.h.bf16 %v1366_v18  ;;  %vm1174_vm8 = vcmask 261120  }
   0x9   :  { %v184_v23 = vmul.f32 %v182_v21, %v180_v19  ;;  %v1399_v33 = vld [vmem:[%s2108_s3 + $0x18] sm:$0xff]   ;;  %v1400_v35 = vld [vmem:[%s2108_s3 + $0x20] sm:$0xff]   ;;  %v1401_v36 = vld [vmem:[%s2108_s3 + $0x28] sm:$0xff]   ;;  %v1371_v38 = vunpack.c.l.bf16 %v1397_v31  ;;  %v1372_v39 = vunpack.c.h.bf16 %v1397_v31  ;;  %v1375_v40 = vunpack.c.l.bf16 %v1398_v32 }
   0xa   :  { %v1402_v41 = vld [vmem:[%s2108_s3 + $0x30] sm:$0xff]   ;;  %v1403_v42 = vld [vmem:[%s2108_s3 + $0x38] sm:$0xff]   ;;  %v1376_v44 = vunpack.c.h.bf16 %v1398_v32  ;;  %v1379_v45 = vunpack.c.l.bf16 %v1399_v33  ;;  %v1380_v46 = vunpack.c.h.bf16 %v1399_v33  ;;  %v1383_v47 = vunpack.c.l.bf16 %v1400_v35 }
   0xb   :  { %144 = vmatpush1.bf16.msra.mxu0 %v1514_v6  ;;  %v186_v25 = vadd.f32 %v185_v24, %v184_v23  ;;  %v1384_v48 = vunpack.c.h.bf16 %v1400_v35  ;;  %v1387_v49 = vunpack.c.l.bf16 %v1401_v36  ;;  %v1388_v50 = vunpack.c.h.bf16 %v1401_v36  ;;  %v1530_v24 = vld [vmem:[%s2110_s4] ss:$8 sps:$4 sm:$0xff]  }
   0xc   :  { %145 = vmatprep.subr.bf16.mxu0 %v1515_v7  ;;  %v1391_v52 = vunpack.c.l.bf16 %v1402_v41  ;;  %v1392_v53 = vunpack.c.h.bf16 %v1402_v41  ;;  %v1395_v54 = vunpack.c.l.bf16 %v1403_v42  ;;  %v1396_v55 = vunpack.c.h.bf16 %v1403_v42 }
   0xd   :  { %v187_v26 = vrot.slane %v186_v25, 4  ;;  %v1635_v23 = vmov 0.0   ;;  %vm1221_vm9 = vcmask 7168  }
   0xe   :  { %316 = vmatprep.mubr.f32.mxu1 %v1635_v23 }
   0xf   :  { %146 = vmatpush1.bf16.msra.mxu0 %v1517_v8  ;;  %v188_v27 = vadd.f32 %v187_v26, %v186_v25  ;;  %v1532_v25 = vld [vmem:[%s2110_s4 + $0x4] ss:$8 sps:$4 sm:$0xff]   ;;  %v1535_v26 = vld [vmem:[%s2110_s4 + $0x14] ss:$8 sps:$4 sm:$0xff]  }
  0x10   :  { %147 = vmatprep.subr.bf16.mxu0 %v1518_v9 }
  0x11   :  { %v189_v28 = vrot.slane %v188_v27, 2 }
  0x13   :  { %148 = vmatpush1.bf16.msra.mxu0 %v1520_v10  ;;  %v190_v29 = vadd.f32 %v189_v28, %v188_v27  ;;  %v1533_v27 = vld [vmem:[%s2110_s4 + $0x10] ss:$8 sps:$4 sm:$0xff]   ;;  %v1538_v28 = vld [vmem:[%s2110_s4 + $0x24] ss:$8 sps:$4 sm:$0xff]  }
  0x14   :  { %149 = vmatprep.subr.bf16.mxu0 %v1521_v11 }
  0x15   :  { %v191_v30 = vrot.slane %v190_v29, 1 }
  0x17   :  { %150 = vmatpush1.bf16.msra.mxu0 %v1523_v12  ;;  %v192_v43 = vadd.f32 %v191_v30, %v190_v29  ;;  %v1536_v29 = vld [vmem:[%s2110_s4 + $0x20] ss:$8 sps:$4 sm:$0xff]  }
  0x18   :  { %151 = vmatprep.subr.bf16.mxu0 %v1524_v13 }
  0x1b   :  { %152 = vmatpush1.bf16.msra.mxu0 %v1526_v14 }
  0x1c   :  { %153 = vmatprep.subr.bf16.mxu0 %v1527_v15 }
  0x1f   :  { %154 = vmatpush1.bf16.msra.mxu0 %v1529_v16 }
  0x20   :  { %441 = vmatprep.subr.bf16.mxu0 %v1532_v25  ;;  %v1596_v25 = vld [vmem:[%s2112_s6 + $0x38] sm:$0xff]  }
  0x22   :  { %172 = vmatmul.mubr.bf16.vlgmr.msra.gmra.mrb[0].mxu0 %v42_v17 }
  0x23   :  { %473 = vmatprep.mubr.bf16.mxu0 %v1634_v1  ;;  %442 = vmatpush1.bf16.msra.mxu0 %v1530_v24  ;;  %v1595_v24 = vld [vmem:[%s2112_s6 + $0x30] sm:$0xff]  }
  0x24   :  { %443 = vmatprep.subr.bf16.mxu0 %v1535_v26  ;;  %v351_v26 = vlaneseq }
  0x27   :  { %444 = vmatpush1.bf16.msra.mxu0 %v1533_v27  ;;  %v352_v27 = vshrl.u32 %v351_v26, 7 }
  0x28   :  { %445 = vmatprep.subr.bf16.mxu0 %v1538_v28 }
  0x29   :  { %v353_v28 = vsub.s32 0, %v352_v27 }
  0x2b   :  { %446 = vmatpush1.bf16.msra.mxu0 %v1536_v29  ;;  %v349_v29 = vld [vmem:[%s2113_s11] ss:$8 sm:$0x3] }
  0xf5   :  { %v173_v51 = vpop.f32.mrb[0].mxu0 }
  0xf6   :  { %v175_v56 = vpop.f32.mrb[1].mxu0  ;;  %v236_v57 = vmul.f32 %v1367_v34, %v173_v51  ;;  %v237_v58 = vmul.f32 %v1368_v37, %v173_v51  ;;  %v238_v59 = vmul.f32 %v1371_v38, %v173_v51  ;;  %v239_v60 = vmul.f32 %v1372_v39, %v173_v51  ;;  %v1541_v37 = vld [vmem:[%s2110_s4 + $0x34] ss:$8 sps:$4 sm:$0xff]   ;;  %v1544_v38 = vld [vmem:[%s2110_s4 + $0x44] ss:$8 sps:$4 sm:$0xff]  }
  0xf7   :  { %v194_v61 = vadd.f32 %v192_v43, %v175_v56  ;;  %v177_v62 = vpop.f32.mrb[2].mxu0  ;;  %v240_v63 = vmul.f32 %v1375_v40, %v173_v51  ;;  %v241_v0 = vmul.f32 %v1376_v44, %v173_v51  ;;  %v242_v2 = vmul.f32 %v1379_v45, %v173_v51  ;;  %447 = vmatprep.subr.bf16.mxu0 %v1541_v37  ;;  %v1542_v39 = vld [vmem:[%s2110_s4 + $0x40] ss:$8 sps:$4 sm:$0xff]   ;;  %v1547_v40 = vld [vmem:[%s2110_s4 + $0x54] ss:$8 sps:$4 sm:$0xff]  }
  0xf8   :  { %v178_v3 = vpop.f32.mrb[3].mxu0  ;;  %v1472_v4 = vpack.c.bf16 %v237_v58, %v236_v57  ;;  %v1476_v5 = vpack.c.bf16 %v239_v60, %v238_v59  ;;  %v243_v6 = vmul.f32 %v1380_v46, %v173_v51  ;;  %v244_v7 = vmul.f32 %v1383_v47, %v173_v51  ;;  %v1548_v43 = vld [vmem:[%s2110_s4 + $0x60] ss:$8 sps:$4 sm:$0xff]   ;;  %v1553_v44 = vld [vmem:[%s2110_s4 + $0x74] ss:$8 sps:$4 sm:$0xff]  }
  0xf9   :  { %vm195_vm0 = vcmp.gt.f32.partialorder %v194_v61, 0.0  ;;  %v196_v8 = vmul.f32 0.2, %v194_v61  ;;  %v1480_v9 = vpack.c.bf16 %v241_v0, %v240_v63  ;;  %v245_v10 = vmul.f32 %v1384_v48, %v173_v51  ;;  %v1551_v45 = vld [vmem:[%s2110_s4 + $0x70] ss:$8 sps:$4 sm:$0xff]  }
  0xfa   :  { %1473 = vmatpush1.bf16.msra.mxu1 %v1472_v4  ;;  %v1484_v11 = vpack.c.bf16 %v243_v6, %v242_v2  ;;  %v246_v12 = vmul.f32 %v1387_v49, %v173_v51  ;;  %v247_v13 = vmul.f32 %v1388_v50, %v173_v51  ;;  %v248_v14 = vmul.f32 %v1391_v52, %v173_v51  ;;  %v1554_v46 = vld [vmem:[%s2111_s5] ss:$8 sps:$4 sm:$0xff]   ;;  %v1556_v47 = vld [vmem:[%s2111_s5 + $0x4] ss:$8 sps:$4 sm:$0xff]   ;;  %v1559_v48 = vld [vmem:[%s2111_s5 + $0x14] ss:$8 sps:$4 sm:$0xff]  }
  0xfb   :  { %v197_v15 = vsel %vm195_vm0, %v194_v61, %v196_v8  ;;  %1475 = vmatprep.subr.bf16.mxu1 %v1397_v31  ;;  %v1488_v16 = vpack.c.bf16 %v245_v10, %v244_v7  ;;  %v249_v17 = vmul.f32 %v1392_v53, %v173_v51  ;;  %v250_v18 = vmul.f32 %v1395_v54, %v173_v51  ;;  %v1557_v49 = vld [vmem:[%s2111_s5 + $0x10] ss:$8 sps:$4 sm:$0xff]   ;;  %v1562_v50 = vld [vmem:[%s2111_s5 + $0x24] ss:$8 sps:$4 sm:$0xff]   ;;  %v1565_v52 = vld [vmem:[%s2111_s5 + $0x34] ss:$8 sps:$4 sm:$0xff]  }
  0xfc   :  { %198 = vmax.xlane.f32.xlu0 %v197_v15  ;;  %v1492_v19 = vpack.c.bf16 %v247_v13, %v246_v12  ;;  %v251_v20 = vmul.f32 %v1396_v55, %v173_v51  ;;  %v1560_v51 = vld [vmem:[%s2111_s5 + $0x20] ss:$8 sps:$4 sm:$0xff]   ;;  %v1563_v53 = vld [vmem:[%s2111_s5 + $0x30] ss:$8 sps:$4 sm:$0xff]   ;;  %v1568_v54 = vld [vmem:[%s2111_s5 + $0x44] ss:$8 sps:$4 sm:$0xff]  }
  0xfd   :  { %v1496_v21 = vpack.c.bf16 %v249_v17, %v248_v14  ;;  %v1566_v55 = vld [vmem:[%s2111_s5 + $0x40] ss:$8 sps:$4 sm:$0xff]   ;;  %v1571_v56 = vld [vmem:[%s2111_s5 + $0x54] ss:$8 sps:$4 sm:$0xff]   ;;  %v1569_v57 = vld [vmem:[%s2111_s5 + $0x50] ss:$8 sps:$4 sm:$0xff]  }
  0xfe   :  { %1477 = vmatpush1.bf16.msra.mxu1 %v1476_v5  ;;  %v1500_v22 = vpack.c.bf16 %v251_v20, %v250_v18  ;;  %v1574_v58 = vld [vmem:[%s2111_s5 + $0x64] ss:$8 sps:$4 sm:$0xff]   ;;  %v1572_v59 = vld [vmem:[%s2111_s5 + $0x60] ss:$8 sps:$4 sm:$0xff]   ;;  %v1577_v60 = vld [vmem:[%s2111_s5 + $0x74] ss:$8 sps:$4 sm:$0xff]  }
  0xff   :  { %1479 = vmatprep.subr.bf16.mxu1 %v1398_v32  ;;  %v1575_v61 = vld [vmem:[%s2111_s5 + $0x70] ss:$8 sps:$4 sm:$0xff]   ;;  %v1580_v62 = vld [vmem:[%s2111_s5 + $0x84] ss:$8 sps:$4 sm:$0xff]   ;;  %v1578_v63 = vld [vmem:[%s2111_s5 + $0x80] ss:$8 sps:$4 sm:$0xff]  }
 0x100   :  { %v1583_v0 = vld [vmem:[%s2111_s5 + $0x94] ss:$8 sps:$4 sm:$0xff]   ;;  %v1581_v2 = vld [vmem:[%s2111_s5 + $0x90] ss:$8 sps:$4 sm:$0xff]   ;;  %v1584_v12 = vld [vmem:[%s2111_s5 + $0xa0] ss:$8 sps:$4 sm:$0xff]  }
 0x101   :  { %v1279_v7 = vld [vmem:[%s2109_s1 + $0x31] ss:$0 sm:$0xff]  ;;  %v1589_v17 = vld [vmem:[%s2112_s6] sm:$0xff]   ;;  %v1590_v18 = vld [vmem:[%s2112_s6 + $0x8] sm:$0xff]  }
 0x102   :  { %1481 = vmatpush1.bf16.msra.mxu1 %v1480_v9  ;;  %v508_v13 = vld [vmem:[%s2111_s5 + $0xb0] sm:$0x33]  ;;  %v1592_v20 = vld [vmem:[%s2112_s6 + $0x18] sm:$0xff]  }
 0x103   :  { %1483 = vmatprep.subr.bf16.mxu1 %v1399_v33  ;;  %v193_v33 = vld [vmem:[%s2109_s1 + $0x20] sm:$0xff]  ;;  %v1320_v14 = vcombine.high %v508_v13, %v508_v13 }
 0x106   :  { %1485 = vmatpush1.bf16.msra.mxu1 %v1484_v11  ;;  %v1586_v11 = vld [vmem:[%s2111_s5 + $0xa4] ss:$8 sps:$4 sm:$0xff]  }
 0x107   :  { %1487 = vmatprep.subr.bf16.mxu1 %v1400_v35 }
 0x10a   :  { %1489 = vmatpush1.bf16.msra.mxu1 %v1488_v16 }
 0x10b   :  { %1491 = vmatprep.subr.bf16.mxu1 %v1401_v36  ;;  %v1539_v36 = vld [vmem:[%s2110_s4 + $0x30] ss:$8 sps:$4 sm:$0xff]  }
 0x10c   :  { %448 = vmatpush1.bf16.msra.mxu0 %v1539_v36 }
 0x10d   :  { %449 = vmatprep.subr.bf16.mxu0 %v1544_v38 }
 0x10e   :  { %1493 = vmatpush1.bf16.msra.mxu1 %v1492_v19  ;;  %v1591_v19 = vld [vmem:[%s2112_s6 + $0x10] sm:$0xff]  }
 0x10f   :  { %1495 = vmatprep.subr.bf16.mxu1 %v1402_v41  ;;  %v1545_v41 = vld [vmem:[%s2110_s4 + $0x50] ss:$8 sps:$4 sm:$0xff]  }
 0x110   :  { %450 = vmatpush1.bf16.msra.mxu0 %v1542_v39 }
 0x111   :  { %451 = vmatprep.subr.bf16.mxu0 %v1547_v40 }
 0x112   :  { %1497 = vmatpush1.bf16.msra.mxu1 %v1496_v21  ;;  %v1593_v21 = vld [vmem:[%s2112_s6 + $0x20] sm:$0xff]  }
 0x113   :  { %1499 = vmatprep.subr.bf16.mxu1 %v1403_v42  ;;  %v1550_v42 = vld [vmem:[%s2110_s4 + $0x64] ss:$8 sps:$4 sm:$0xff]  }
 0x114   :  { %452 = vmatpush1.bf16.msra.mxu0 %v1545_v41 }
 0x115   :  { %453 = vmatprep.subr.bf16.mxu0 %v1550_v42 }
 0x116   :  { %1501 = vmatpush1.bf16.msra.mxu1 %v1500_v22  ;;  %v1594_v22 = vld [vmem:[%s2112_s6 + $0x28] sm:$0xff]  }
 0x117   :  { %648 = vmatprep.subr.bf16.mxu1 %v1556_v47  ;;  %v1600_v47 = vld [vmem:[%s2114_s7 + $0x8] sm:$0xff]  }
 0x118   :  { %454 = vmatpush1.bf16.msra.mxu0 %v1548_v43  ;;  %v1597_v43 = vld [vmem:[%s2112_s6 + $0x40] sm:$0xff]  }
 0x119   :  { %455 = vmatprep.subr.bf16.mxu0 %v1553_v44  ;;  %v1598_v44 = vld [vmem:[%s2112_s6 + $0x48] ss:$0 sps:$4 sm:$0x77]  }
 0x11c   :  { %456 = vmatpush1.bf16.msra.mxu0 %v1551_v45  ;;  %v776_v45 = vsel %vm774_vm3, %v1598_v44, 0 }
 0x11d   :  { %778 = vmatprep.subr.bf16.mxu0 %v1634_v1 }
 0x189   :  { %v199_v30 = vpop.xlane.xlu0 %198 }
 0x18a   :  { %v200_v31 = vsub.f32 %v197_v15, %v199_v30  ;;  %v1319_v15 = vcombine.low %v508_v13, %v508_v13  ;;  %v357_v30 = vsub.s32 1, %v352_v27  ;;  %v1612_v27 = vld [vmem:[%s2116_s9] sm:$0xff]  }
 0x18c   :  { %v201_v32 = vmul.f32 1.442695, %v200_v31  ;;  %v643_v16 = vsel %vm641_vm1, %v1319_v15, 0  ;;  %v354_v31 = vrot.slane %v349_v29, %v353_v28  ;;  %v1609_v15 = vld [vmem:[%s2115_s8 + $0x10] sm:$0xff]  }
 0x18e   :  { %1626 = vpow2.f32 %v201_v32  ;;  %v358_v32 = vrot.slane %v349_v29, %v357_v30  ;;  %v1613_v29 = vld [vmem:[%s2116_s9 + $0x8] sm:$0xff]  }
 0x198   :  { %v1627_v34 = vpop.eup %1626 }
 0x199   :  { %v203_v35 = vmul.f32 %v1627_v34, %v193_v33 }
 0x19b   :  { %317 = vmatmul.mubr.f32.vlgmr.msra.gmra.mrb[0].mxu1 %v203_v35 }
 0x19c   :  { %649 = vmatpush1.bf16.msra.mxu1 %v1554_v46  ;;  %v1599_v46 = vld [vmem:[%s2114_s7] sm:$0xff]  }
 0x19d   :  { %650 = vmatprep.subr.bf16.mxu1 %v1559_v48  ;;  %v1601_v48 = vld [vmem:[%s2114_s7 + $0x10] sm:$0xff]  }
 0x1a0   :  { %651 = vmatpush1.bf16.msra.mxu1 %v1557_v49  ;;  %v1602_v49 = vld [vmem:[%s2114_s7 + $0x18] sm:$0xff]  }
 0x1a1   :  { %652 = vmatprep.subr.bf16.mxu1 %v1562_v50  ;;  %v1603_v50 = vld [vmem:[%s2114_s7 + $0x20] sm:$0xff]  }
 0x1a4   :  { %653 = vmatpush1.bf16.msra.mxu1 %v1560_v51  ;;  %v1604_v51 = vld [vmem:[%s2114_s7 + $0x28] sm:$0xff]  }
 0x1a5   :  { %654 = vmatprep.subr.bf16.mxu1 %v1565_v52  ;;  %v1296_v52 = vld [vmem:[%s2113_s11 + $0x1] ss:$8 sm:$0x3] }
 0x1a8   :  { %655 = vmatpush1.bf16.msra.mxu1 %v1563_v53  ;;  %v515_v53 = vrot.slane %v1296_v52, %v353_v28 }
 0x1a9   :  { %656 = vmatprep.subr.bf16.mxu1 %v1568_v54  ;;  %v519_v54 = vrot.slane %v1296_v52, %v357_v30  ;;  %v1614_v30 = vld [vmem:[%s2116_s9 + $0x10] sm:$0xff]  }
 0x1ac   :  { %657 = vmatpush1.bf16.msra.mxu1 %v1566_v55 }
 0x1ad   :  { %658 = vmatprep.subr.bf16.mxu1 %v1571_v56 }
 0x1b0   :  { %659 = vmatpush1.bf16.msra.mxu1 %v1569_v57 }
 0x1b1   :  { %660 = vmatprep.subr.bf16.mxu1 %v1574_v58 }
 0x1b4   :  { %661 = vmatpush1.bf16.msra.mxu1 %v1572_v59 }
 0x1b5   :  { %662 = vmatprep.subr.bf16.mxu1 %v1577_v60 }
 0x1b8   :  { %663 = vmatpush1.bf16.msra.mxu1 %v1575_v61 }
 0x1b9   :  { %664 = vmatprep.subr.bf16.mxu1 %v1580_v62 }
 0x1bc   :  { %665 = vmatpush1.bf16.msra.mxu1 %v1578_v63 }
 0x1bd   :  { %666 = vmatprep.subr.bf16.mxu1 %v1583_v0 }
 0x1c0   :  { %667 = vmatpush1.bf16.msra.mxu1 %v1581_v2  ;;  %v1605_v2 = vld [vmem:[%s2114_s7 + $0x30] sm:$0xff]  }
 0x1c1   :  { %668 = vmatprep.subr.bf16.mxu1 %v1586_v11 }
 0x1c4   :  { %669 = vmatpush1.bf16.msra.mxu1 %v1584_v12  ;;  %v1607_v12 = vld [vmem:[%s2115_s8] sm:$0xff]  }
 0x1c5   :  { %1321 = vmatprep.subr.msk.bf16.mxu1 %vm641_vm1, %v1320_v14  ;;  %v1608_v14 = vld [vmem:[%s2115_s8 + $0x8] sm:$0xff]  }
 0x1c8   :  { %671 = vmatpush1.bf16.msra.mxu1 %v643_v16  ;;  %v1610_v16 = vld [vmem:[%s2115_s8 + $0x18] sm:$0xff]  }
 0x1c9   :  { %1424 = vmatprep.subr.bf16.mxu1 %v1635_v23 }
 0x26e   :  { %v318_v3 = vpop.f32.mrb[0].mxu1 }
 0x26f   :  { %v320_v4 = vpop.f32.mrb[1].mxu1 }
 0x270   :  { %v323_v5 = vmax.f32 %v320_v4, 1e-30  ;;  %v712_v4 = vld [vmem:[%s2113_s11 + $0x2] ss:$0 sm:$0xff] }
 0x272   :  { %1628 = vrcp.f32 %v323_v5 }
 0x27c   :  { %v1629_v6 = vpop.eup %1628 }
 0x27d   :  { %v326_v8 = vmul.f32 %v1629_v6, %v318_v3  ;;  %v1606_v3 = vld [vmem:[%s2114_s7 + $0x38] sm:$0xff]  }
 0x27f   :  { %v331_v9 = vadd.f32 %v1279_v7, %v326_v8 }
 0x281   :  { %v1908_v10 = vpack.c.bf16 %v331_v9, %v331_v9 }
 0x283   :  { %474 = vmatmul.mubr.bf16.vlgmr.msra.gmra.mrb[4].mxu0 %v1908_v10 }
 0x284   :  { %779 = vmatpush1.bf16.msra.mxu0 %v1589_v17  ;;  %v1611_v17 = vld [vmem:[%s2115_s8 + $0x20] sm:$0xff]  }
 0x285   :  { %780 = vmatprep.subr.bf16.mxu0 %v1634_v1 }
 0x288   :  { %781 = vmatpush1.bf16.msra.mxu0 %v1590_v18  ;;  %v836_v18 = vld [vmem:[%s2113_s11 + $0x3] ss:$0 sm:$0xff] }
 0x289   :  { %782 = vmatprep.subr.bf16.mxu0 %v1634_v1 }
 0x28c   :  { %783 = vmatpush1.bf16.msra.mxu0 %v1591_v19 }
 0x28d   :  { %784 = vmatprep.subr.bf16.mxu0 %v1634_v1 }
 0x290   :  { %785 = vmatpush1.bf16.msra.mxu0 %v1592_v20 }
 0x291   :  { %786 = vmatprep.subr.bf16.mxu0 %v1634_v1 }
 0x294   :  { %787 = vmatpush1.bf16.msra.mxu0 %v1593_v21 }
 0x295   :  { %788 = vmatprep.subr.bf16.mxu0 %v1634_v1 }
 0x298   :  { %789 = vmatpush1.bf16.msra.mxu0 %v1594_v22 }
 0x299   :  { %790 = vmatprep.subr.bf16.mxu0 %v1634_v1 }
 0x29c   :  { %791 = vmatpush1.bf16.msra.mxu0 %v1595_v24 }
 0x29d   :  { %792 = vmatprep.subr.bf16.mxu0 %v1634_v1 }
 0x2a0   :  { %793 = vmatpush1.bf16.msra.mxu0 %v1596_v25 }
 0x2a1   :  { %794 = vmatprep.subr.bf16.mxu0 %v1634_v1 }
 0x2a4   :  { %795 = vmatpush1.bf16.msra.mxu0 %v1597_v43 }
 0x2a5   :  { %796 = vmatprep.subr.bf16.mxu0 %v1634_v1 }
 0x2a8   :  { %797 = vmatpush1.bf16.msra.mxu0 %v776_v45 }
 0x2a9   :  { %1178 = vmatprep.subr.bf16.mxu0 %v1634_v1 }
 0x356   :  { %v475_v33 = vpop.f32.mrb[4].mxu0 }
 0x357   :  { %v476_v34 = vadd.f32 %v475_v33, %v354_v31  ;;  %v477_v35 = vpop.f32.mrb[5].mxu0  ;;  %v1615_v31 = vld [vmem:[%s2116_s9 + $0x18] sm:$0xff]   ;;  %v1617_v33 = vld [vmem:[%s2117_s10 + $0x8] sm:$0xff]  }
 0x358   :  { %v478_v36 = vadd.f32 %v477_v35, %v358_v32  ;;  %v479_v37 = vpop.f32.mrb[6].mxu0  ;;  %v1616_v32 = vld [vmem:[%s2117_s10] sm:$0xff]  }
 0x359   :  { %v482_v38 = vmax.f32 %v476_v34, 0.0  ;;  %v480_v39 = vpop.f32.mrb[7].mxu0  ;;  %v1618_v34 = vld [vmem:[%s2117_s10 + $0x10] sm:$0xff]   ;;  %v1620_v35 = vld [vmem:[%s2117_s10 + $0x20] sm:$0xff]  }
 0x35a   :  { %v483_v40 = vmax.f32 %v478_v36, 0.0  ;;  %v1621_v36 = vld [vmem:[%s2117_s10 + $0x28] sm:$0xff]   ;;  %v1622_v37 = vld [vmem:[%s2117_s10 + $0x30] sm:$0xff]   ;;  %v937_v39 = vld [vmem:[%s2113_s11 + $0x4] ss:$0 sm:$0xff] }
 0x35b   :  { %v484_v42 = vpack.c.bf16 %v482_v38, %v482_v38  ;;  %v1623_v38 = vld [vmem:[%s2117_s10 + $0x38] sm:$0xff]  }
 0x35c   :  { %v485_v41 = vpack.c.bf16 %v483_v40, %v483_v40 }
 0x35e   :  { %1322 = vmatprep.mubr.msk.bf16.mxu1 %vm637_vm2, %v485_v41 }
 0x35f   :  { %681 = vmatmul.mubr.bf16.vlgmr.msra.gmra.mrb[4].mxu1 %v484_v42 }
 0x360   :  { %1425 = vmatpush3.bf16.msra.mxu1 %v1599_v46  ;;  %1440 = vmatprep.mubr.msk.bf16.mxu1 %vm1636_vm5, %v1635_v23 }
 0x361   :  { %1426 = vmatprep.subr.bf16.mxu1 %v1635_v23 }
 0x364   :  { %1427 = vmatpush3.bf16.msra.mxu1 %v1600_v47  ;;  %v1624_v47 = vld [vmem:[%s2117_s10 + $0x40] sm:$0xff]  }
 0x365   :  { %1428 = vmatprep.subr.bf16.mxu1 %v1635_v23 }
 0x368   :  { %1429 = vmatpush3.bf16.msra.mxu1 %v1601_v48  ;;  %v1625_v48 = vld [vmem:[%s2117_s10 + $0x48] sm:$0xff]  }
 0x369   :  { %1430 = vmatprep.subr.bf16.mxu1 %v1635_v23 }
 0x36c   :  { %1431 = vmatpush3.bf16.msra.mxu1 %v1602_v49  ;;  %v1022_v49 = vld [vmem:[%s2113_s11 + $0x5] ss:$0 sm:$0xff] }
 0x36d   :  { %1432 = vmatprep.subr.bf16.mxu1 %v1635_v23 }
 0x370   :  { %1433 = vmatpush3.bf16.msra.mxu1 %v1603_v50 }
 0x371   :  { %1434 = vmatprep.subr.bf16.mxu1 %v1635_v23 }
 0x374   :  { %1435 = vmatpush3.bf16.msra.mxu1 %v1604_v51 }
 0x375   :  { %1436 = vmatprep.subr.bf16.mxu1 %v1635_v23 }
 0x378   :  { %1437 = vmatpush3.bf16.msra.mxu1 %v1605_v2 }
 0x379   :  { %1438 = vmatprep.subr.bf16.mxu1 %v1635_v23 }
 0x37c   :  { %1439 = vmatpush3.bf16.msra.mxu1 %v1606_v3 }
 0x37d   :  { %1444 = vmatprep.subr.bf16.mxu1 %v1635_v23 }
 0x432   :  { %v682_v55 = vpop.f32.mrb[4].mxu1 }
 0x433   :  { %v683_v56 = vadd.f32 %v682_v55, %v515_v53  ;;  %v684_v57 = vpop.f32.mrb[5].mxu1 }
 0x434   :  { %v685_v58 = vadd.f32 %v684_v57, %v519_v54  ;;  %v686_v59 = vpop.f32.mrb[6].mxu1 }
 0x435   :  { %v689_v60 = vmax.f32 %v683_v56, 0.0  ;;  %v687_v61 = vpop.f32.mrb[7].mxu1 }
 0x436   :  { %v690_v62 = vmax.f32 %v685_v58, 0.0 }
 0x437   :  { %v691_v0 = vpack.c.bf16 %v689_v60, %v689_v60 }
 0x438   :  { %v692_v63 = vpack.c.bf16 %v690_v62, %v690_v62 }
 0x43a   :  { %1333 = vmatprep.mubr.msk.bf16.mxu0 %vm770_vm4, %v692_v63 }
 0x43b   :  { %811 = vmatmul.mubr.bf16.vlgmr.msra.gmra.mrb[8].mxu0 %v691_v0 }
 0x43c   :  { %1179 = vmatpush1.bf16.msra.mxu0 %v1616_v32 }
 0x43d   :  { %1180 = vmatprep.subr.bf16.mxu0 %v1634_v1 }
 0x440   :  { %1181 = vmatpush1.bf16.msra.mxu0 %v1617_v33 }
 0x441   :  { %1182 = vmatprep.subr.bf16.mxu0 %v1634_v1 }
 0x444   :  { %1183 = vmatpush1.bf16.msra.mxu0 %v1618_v34 }
 0x445   :  { %1184 = vmatprep.subr.bf16.mxu0 %v1634_v1 }
 0x50e   :  { %v812_v5 = vpop.f32.mrb[8].mxu0 }
 0x50f   :  { %v813_v6 = vadd.f32 %v812_v5, %v712_v4  ;;  %v814_v7 = vpop.f32.mrb[9].mxu0 }
 0x510   :  { %v815_v8 = vpop.f32.mrb[10].mxu0 }
 0x511   :  { %v818_v9 = vmax.f32 %v813_v6, 0.0  ;;  %v816_v11 = vpop.f32.mrb[11].mxu0  ;;  %v1218_v8 = vld [vmem:[%s2109_s1 + $0x28] sm:$0xff] }
 0x512   :  { %vm1220_vm10 = vcmp.gt.f32.partialorder %v1218_v8, 0.0 }
 0x513   :  { %v819_v13 = vpack.c.bf16 %v818_v9, %v818_v9 }
 0x515   :  { %1441 = vmatmul.mubr.bf16.vlgmr.msra.gmra.mrb[8].mxu1 %v819_v13 }
 0x516   :  { %1445 = vmatpush3.bf16.msra.mxu1 %v1607_v12  ;;  %1454 = vmatprep.mubr.msk.bf16.mxu1 %vm1636_vm5, %v1635_v23 }
 0x517   :  { %1446 = vmatprep.subr.bf16.mxu1 %v1635_v23 }
 0x51a   :  { %1447 = vmatpush3.bf16.msra.mxu1 %v1608_v14 }
 0x51b   :  { %1448 = vmatprep.subr.bf16.mxu1 %v1635_v23 }
 0x51e   :  { %1449 = vmatpush3.bf16.msra.mxu1 %v1609_v15 }
 0x51f   :  { %1450 = vmatprep.subr.bf16.mxu1 %v1635_v23 }
 0x522   :  { %1451 = vmatpush3.bf16.msra.mxu1 %v1610_v16 }
 0x523   :  { %1452 = vmatprep.subr.bf16.mxu1 %v1635_v23 }
 0x526   :  { %1453 = vmatpush3.bf16.msra.mxu1 %v1611_v17 }
 0x527   :  { %1458 = vmatprep.subr.bf16.mxu1 %v1635_v23 }
 0x5e8   :  { %v919_v19 = vpop.f32.mrb[8].mxu1 }
 0x5e9   :  { %v920_v20 = vadd.f32 %v919_v19, %v836_v18  ;;  %v1442_v21 = vpop.f32.mrb[9].mxu1 }
 0x5ea   :  { %v922_v22 = vpop.f32.mrb[10].mxu1 }
 0x5eb   :  { %v925_v24 = vmax.f32 %v920_v20, 0.0  ;;  %v1443_v25 = vpop.f32.mrb[11].mxu1  ;;  %v1364_v20 = vld [vmem:[%s2109_s1 + $0x30] ss:$0 sm:$0xff] }
 0x5ed   :  { %v926_v28 = vpack.c.bf16 %v925_v24, %v925_v24  ;;  %v1255_v24 = vand.u32 127, %v351_v26 }
 0x5ef   :  { %1455 = vmatmul.mubr.msk.bf16.vlgmr.msra.gmra.mrb[12].mxu1 %vm968_vm6, %v926_v28  ;;  %vm1256_vm11 = vcmp.eq.s32.totalorder %v1255_v24, 4 }
 0x5f0   :  { %1459 = vmatpush3.bf16.msra.mxu1 %v1612_v27  ;;  %1466 = vmatprep.mubr.msk.bf16.mxu1 %vm1636_vm5, %v1635_v23 }
 0x5f1   :  { %1460 = vmatprep.subr.bf16.mxu1 %v1635_v23 }
 0x5f4   :  { %1461 = vmatpush3.bf16.msra.mxu1 %v1613_v29 }
 0x5f5   :  { %1462 = vmatprep.subr.bf16.mxu1 %v1635_v23 }
 0x5f8   :  { %1463 = vmatpush3.bf16.msra.mxu1 %v1614_v30 }
 0x5f9   :  { %1464 = vmatprep.subr.bf16.mxu1 %v1635_v23  ;;  %v1619_v23 = vld [vmem:[%s2117_s10 + $0x18] sm:$0xff]  }
 0x5fa   :  { %1185 = vmatpush1.bf16.msra.mxu0 %v1619_v23 }
 0x5fb   :  { %1186 = vmatprep.subr.bf16.mxu0 %v1634_v1 }
 0x5fc   :  { %1465 = vmatpush3.bf16.msra.mxu1 %v1615_v31 }
 0x5fe   :  { %1187 = vmatpush1.bf16.msra.mxu0 %v1620_v35 }
 0x5ff   :  { %1188 = vmatprep.subr.bf16.mxu0 %v1634_v1 }
 0x602   :  { %1189 = vmatpush1.bf16.msra.mxu0 %v1621_v36 }
 0x603   :  { %1190 = vmatprep.subr.bf16.mxu0 %v1634_v1 }
 0x606   :  { %1191 = vmatpush1.bf16.msra.mxu0 %v1622_v37 }
 0x607   :  { %1192 = vmatprep.subr.bf16.mxu0 %v1634_v1 }
 0x60a   :  { %1193 = vmatpush1.bf16.msra.mxu0 %v1623_v38 }
 0x60b   :  { %1194 = vmatprep.subr.bf16.mxu0 %v1634_v1 }
 0x60e   :  { %1195 = vmatpush1.bf16.msra.mxu0 %v1624_v47 }
 0x60f   :  { %1196 = vmatprep.subr.bf16.mxu0 %v1634_v1  ;;  %v1113_v1 = vld [vmem:[%s2113_s11 + $0x6] ss:$0 sm:$0xff] }
 0x612   :  { %1197 = vmatpush1.bf16.msra.mxu0 %v1625_v48 }
 0x6c2   :  { %v1006_v40 = vpop.f32.mrb[12].mxu1 }
 0x6c3   :  { %v1007_v41 = vadd.f32 %v1006_v40, %v937_v39  ;;  %v1456_v42 = vpop.f32.mrb[13].mxu1 }
 0x6c4   :  { %v1009_v43 = vpop.f32.mrb[14].mxu1 }
 0x6c5   :  { %v1012_v44 = vmax.f32 %v1007_v41, 0.0  ;;  %v1457_v45 = vpop.f32.mrb[15].mxu1 }
 0x6c7   :  { %v1013_v46 = vpack.c.bf16 %v1012_v44, %v1012_v44 }
 0x6c9   :  { %1467 = vmatmul.mubr.msk.bf16.vlgmr.msra.gmra.mrb[16].mxu1 %vm1047_vm7, %v1013_v46 }
 0x79c   :  { %v1085_v50 = vpop.f32.mrb[16].mxu1 }
 0x79d   :  { %v1086_v51 = vadd.f32 %v1085_v50, %v1022_v49  ;;  %v1468_v52 = vpop.f32.mrb[17].mxu1 }
 0x79e   :  { %v1088_v53 = vpop.f32.mrb[18].mxu1 }
 0x79f   :  { %v1091_v54 = vmax.f32 %v1086_v51, 0.0  ;;  %v1469_v55 = vpop.f32.mrb[19].mxu1 }
 0x7a1   :  { %v1092_v56 = vpack.c.bf16 %v1091_v54, %v1091_v54 }
 0x7a3   :  { %1363 = vmatprep.mubr.msk.bf16.mxu0 %vm1174_vm8, %v1092_v56 }
 0x7a4   :  { %1211 = vmatmul.mubr.bf16.vlgmr.msra.gmra.mrb[12].mxu0 %v1908_v10 }
 0x877   :  { %v1212_v57 = vpop.f32.mrb[12].mxu0 }
 0x878   :  { %v1213_v58 = vadd.f32 %v1212_v57, %v1113_v1  ;;  %v1214_v59 = vpop.f32.mrb[13].mxu0 }
 0x879   :  { %v1215_v60 = vpop.f32.mrb[14].mxu0 }
 0x87a   :  { %v1222_v61 = vsel %vm1221_vm9, %v1213_v58, -inf  ;;  %v1216_v62 = vpop.f32.mrb[15].mxu0 }
 0x87b   :  { %v1223_v63 = vrot.slane %v1222_v61, 4 }
 0x87d   :  { %v1224_v0 = vmax.f32 %v1222_v61, %v1223_v63 }
 0x87f   :  { %v1225_v2 = vrot.slane %v1224_v0, 2 }
 0x881   :  { %v1226_v3 = vmax.f32 %v1224_v0, %v1225_v2 }
 0x883   :  { %v1227_v4 = vrot.slane %v1226_v3, 1 }
 0x885   :  { %v1228_v5 = vmax.f32 %v1226_v3, %v1227_v4 }
 0x887   :  { %v1229_v6 = vsub.f32 %v1213_v58, %v1228_v5 }
 0x889   :  { %v1230_v7 = vmul.f32 1.442695, %v1229_v6 }
 0x88b   :  { %1630 = vpow2.f32 %v1230_v7 }
 0x895   :  { %v1631_v10 = vpop.eup %1630 }
 0x896   :  { %1234 = vperm.xlu0 %1505, %v1631_v10  }
 0x915   :  { %v1235_v9 = vpop.permute.xlu0 %1234 }
 0x916   :  { %v1237_v11 = vsel %vm1220_vm10, %v1235_v9, 0.0 }
 0x917   :  { %v1238_v12 = vrot.slane %v1237_v11, 4 }
 0x919   :  { %v1239_v13 = vadd.f32 %v1238_v12, %v1237_v11 }
 0x91b   :  { %v1240_v14 = vrot.slane %v1239_v13, 2 }
 0x91d   :  { %v1241_v15 = vadd.f32 %v1240_v14, %v1239_v13 }
 0x91f   :  { %v1242_v16 = vrot.slane %v1241_v15, 1 }
 0x921   :  { %v1243_v17 = vadd.f32 %v1242_v16, %v1241_v15 }
 0x923   :  { %v1244_v18 = vmax.f32 %v1243_v17, 1e-30 }
 0x925   :  { %1632 = vrcp.f32 %v1244_v18 }
 0x92f   :  { %v1633_v19 = vpop.eup %1632 }
 0x930   :  { %v1246_v21 = vmul.f32 %v1633_v19, %v1237_v11 }
 0x932   :  { %v1251_v22 = vmul.f32 %v1364_v20, %v1246_v21 }
 0x934   :  { %1252 = vadd.xlane.f32.xlu1 %v1251_v22 }
 0x9c1   :  { %v1253_v25 = vpop.xlane.xlu1 %1252 }
 0x9c2   :  { %v1257_v27 = vsel %vm1256_vm11, %v1253_v25, %v1246_v21 }
 0x9c3   :  { %1258 = vst [vmem:[%s2118_s12] sm:$0xff] %v1257_v27 }

</bundles_post_ra>
